<compile_context>
chip_gen: v7x
topology: tpu7x:2x2x1
jax: 0.10.0
libtpu: 0.0.40
codegen_flags: <defaults>
</compile_context>

<pallas_src>
import jax
import jax.numpy as jnp
import numpy as np
from jax.experimental import pallas as pl
from jax.experimental.pallas import tpu as pltpu


def qnet_kernel(x_ref, w1_ref, b1_ref, w2_ref, b2_ref, w3_ref, b3_ref, o_ref):
    """One batch tile of the MLP: 3 MXU matmuls + SiLU (sigmoid on the EUP)."""
    x = x_ref[...]

    # fc1 + SiLU
    h1 = jnp.dot(x, w1_ref[...], preferred_element_type=jnp.float32) + b1_ref[...]
    h1 = h1 * jax.nn.sigmoid(h1)          # silu(x) = x * sigmoid(x); logistic -> EUP

    # fc2 + SiLU
    h2 = jnp.dot(h1, w2_ref[...], preferred_element_type=jnp.float32) + b2_ref[...]
    h2 = h2 * jax.nn.sigmoid(h2)

    # fc3 (no activation); output tile is lane-dense (padded to a multiple of 128)
    o_ref[...] = (jnp.dot(h2, w3_ref[...], preferred_element_type=jnp.float32)
                  + b3_ref[...]).astype(o_ref.dtype)


def _round_up(x, m):
    return (x + m - 1) // m * m


def qnet_forward(x, w1, b1, w2, b2, w3, b3):
    """Pads to TPU-friendly shapes, runs the Pallas kernel over batch tiles, slices back."""
    B, n_in = x.shape
    H = w1.shape[1]
    n_actions = w3.shape[1]

    # Lane-dense feature dims (multiples of 128).
    K_pad = _round_up(max(n_in, 128), 128)
    N_pad = _round_up(max(n_actions, 128), 128)

    # Sublane-aligned batch tile: 128-row tiles for real batches, 8-row for tiny ones.
    TB = min(128, _round_up(B, 8))
    B_pad = _round_up(B, TB)

    # Zero-pad: padded x columns meet zero w1 rows (no effect on h1); padded w3/b3
    # columns produce zero outputs that are sliced off; padded batch rows are sliced off.
    xp = jnp.zeros((B_pad, K_pad), x.dtype).at[:B, :n_in].set(x)
    w1p = jnp.zeros((K_pad, H), w1.dtype).at[:n_in, :].set(w1)
    w3p = jnp.zeros((H, N_pad), w3.dtype).at[:, :n_actions].set(w3)
    b3p = jnp.zeros((1, N_pad), b3.dtype).at[:, :n_actions].set(b3)

    grid = (B_pad // TB,)

    out = pl.pallas_call(
        qnet_kernel,
        grid=grid,
        out_shape=jax.ShapeDtypeStruct((B_pad, N_pad), jnp.float32),
        in_specs=[
            pl.BlockSpec((TB, K_pad), lambda i: (i, 0)),   # x: tiled over batch
            pl.BlockSpec((K_pad, H), lambda i: (0, 0)),    # w1: resident
            pl.BlockSpec((1, H), lambda i: (0, 0)),        # b1: resident
            pl.BlockSpec((H, H), lambda i: (0, 0)),        # w2: resident
            pl.BlockSpec((1, H), lambda i: (0, 0)),        # b2: resident
            pl.BlockSpec((H, N_pad), lambda i: (0, 0)),    # w3: resident (padded cols)
            pl.BlockSpec((1, N_pad), lambda i: (0, 0)),    # b3: resident (padded cols)
        ],
        out_specs=pl.BlockSpec((TB, N_pad), lambda i: (i, 0)),
        compiler_params=pltpu.CompilerParams(
            dimension_semantics=("parallel",),
        ),
    )(xp, w1p, b1, w2, b2, w3p, b3p)

    return out[:B, :n_actions]


def init_params(key, n_input, hidden, n_actions):
    """Deterministic synthetic parameters (weights stored as (in, out))."""
    ks = jax.random.split(key, 6)
    s1 = 1.0 / np.sqrt(n_input)
    s2 = 1.0 / np.sqrt(hidden)
    w1 = jax.random.uniform(ks[0], (n_input, hidden), jnp.float32, -s1, s1)
    b1 = jax.random.uniform(ks[1], (1, hidden), jnp.float32, -s1, s1)
    w2 = jax.random.uniform(ks[2], (hidden, hidden), jnp.float32, -s2, s2)
    b2 = jax.random.uniform(ks[3], (1, hidden), jnp.float32, -s2, s2)
    w3 = jax.random.uniform(ks[4], (hidden, n_actions), jnp.float32, -s2, s2)
    b3 = jax.random.uniform(ks[5], (1, n_actions), jnp.float32, -s2, s2)
    return w1, b1, w2, b2, w3, b3


def reference_forward(x, w1, b1, w2, b2, w3, b3):
    h1 = x @ w1 + b1
    h1 = h1 * jax.nn.sigmoid(h1)
    h2 = h1 @ w2 + b2
    h2 = h2 * jax.nn.sigmoid(h2)
    return h2 @ w3 + b3


if __name__ == "__main__":
    # Small shapes consistent with the module: flat observation vector -> Q-values.
    batch = 2
    n_input_channels = 32
    hidden = 512           # fixed by the module definition
    n_actions = 124        # sample_action's randint(0, 123) implies 124 actions

    key = jax.random.PRNGKey(0)
    kx, kp = jax.random.split(key)
    x = jax.random.normal(kx, (batch, n_input_channels), jnp.float32)
    params = init_params(kp, n_input_channels, hidden, n_actions)

    out = qnet_forward(x, *params)
    out = jax.block_until_ready(out)

    ref = reference_forward(x, *params)
    assert out.shape == (batch, n_actions)
    assert np.allclose(np.asarray(out), np.asarray(ref), atol=1e-4, rtol=1e-4)

    print("KERNEL_OK")
</pallas_src>

<mosaic_0001>
module attributes {stable_mosaic.version = 11 : i64} {
  func.func @qnet_kernel(%arg0: i32, %arg1: memref<8x128xf32, #tpu.memory_space<vmem>>, %arg2: memref<128x512xf32, #tpu.memory_space<vmem>>, %arg3: memref<1x512xf32, #tpu.memory_space<vmem>>, %arg4: memref<512x512xf32, #tpu.memory_space<vmem>>, %arg5: memref<1x512xf32, #tpu.memory_space<vmem>>, %arg6: memref<512x128xf32, #tpu.memory_space<vmem>>, %arg7: memref<1x128xf32, #tpu.memory_space<vmem>>, %arg8: memref<8x128xf32, #tpu.memory_space<vmem>>) attributes {dimension_semantics = [#tpu.dimension_semantics<parallel>], iteration_bounds = array<i64: 1>, scalar_prefetch = 0 : i64, scratch_operands = 0 : i64, tpu.core_type = #tpu.core_type<tc>, window_params = [{transform_indices = @transform_0, window_bounds = array<i64: 8, 128>}, {pipeline_mode = #tpu.pipeline_mode<synchronous>, transform_indices = @transform_1, window_bounds = array<i64: 128, 512>}, {pipeline_mode = #tpu.pipeline_mode<synchronous>, transform_indices = @transform_2, window_bounds = array<i64: 1, 512>}, {pipeline_mode = #tpu.pipeline_mode<synchronous>, transform_indices = @transform_3, window_bounds = array<i64: 512, 512>}, {pipeline_mode = #tpu.pipeline_mode<synchronous>, transform_indices = @transform_4, window_bounds = array<i64: 1, 512>}, {pipeline_mode = #tpu.pipeline_mode<synchronous>, transform_indices = @transform_5, window_bounds = array<i64: 512, 128>}, {pipeline_mode = #tpu.pipeline_mode<synchronous>, transform_indices = @transform_6, window_bounds = array<i64: 1, 128>}, {transform_indices = @transform_7, window_bounds = array<i64: 8, 128>}]} {
    %c0 = arith.constant 0 : index
    %c0_0 = arith.constant 0 : index
    %0 = vector.load %arg1[%c0, %c0_0] : memref<8x128xf32, #tpu.memory_space<vmem>>, vector<8x128xf32>
    %c0_1 = arith.constant 0 : index
    %c0_2 = arith.constant 0 : index
    %1 = vector.load %arg2[%c0_1, %c0_2] : memref<128x512xf32, #tpu.memory_space<vmem>>, vector<128x512xf32>
    %cst = arith.constant dense<0.000000e+00> : vector<8x512xf32>
    %2 = tpu.matmul %0, %1, %cst {dimension_numbers = #tpu.dot_dimension_numbers<[1], [0], [0], [1], [0, 0, 1, 1], [], []>} : vector<8x128xf32>, vector<128x512xf32>, vector<8x512xf32> -> vector<8x512xf32>
    %c0_3 = arith.constant 0 : index
    %c0_4 = arith.constant 0 : index
    %3 = vector.load %arg3[%c0_3, %c0_4] : memref<1x512xf32, #tpu.memory_space<vmem>>, vector<1x512xf32>
    %4 = vector.broadcast %3 : vector<1x512xf32> to vector<8x512xf32>
    %5 = arith.addf %2, %4 : vector<8x512xf32>
    %6 = arith.negf %5 : vector<8x512xf32>
    %7 = math.exp %6 : vector<8x512xf32>
    %cst_5 = arith.constant 1.000000e+00 : f32
    %8 = vector.broadcast %cst_5 : f32 to vector<8x512xf32>
    %9 = arith.addf %8, %7 : vector<8x512xf32>
    %10 = arith.divf %8, %9 : vector<8x512xf32>
    %11 = arith.mulf %5, %10 : vector<8x512xf32>
    %c0_6 = arith.constant 0 : index
    %c0_7 = arith.constant 0 : index
    %12 = vector.load %arg4[%c0_6, %c0_7] : memref<512x512xf32, #tpu.memory_space<vmem>>, vector<512x512xf32>
    %cst_8 = arith.constant dense<0.000000e+00> : vector<8x512xf32>
    %13 = tpu.matmul %11, %12, %cst_8 {dimension_numbers = #tpu.dot_dimension_numbers<[1], [0], [0], [1], [0, 0, 1, 1], [], []>} : vector<8x512xf32>, vector<512x512xf32>, vector<8x512xf32> -> vector<8x512xf32>
    %c0_9 = arith.constant 0 : index
    %c0_10 = arith.constant 0 : index
    %14 = vector.load %arg5[%c0_9, %c0_10] : memref<1x512xf32, #tpu.memory_space<vmem>>, vector<1x512xf32>
    %15 = vector.broadcast %14 : vector<1x512xf32> to vector<8x512xf32>
    %16 = arith.addf %13, %15 : vector<8x512xf32>
    %17 = arith.negf %16 : vector<8x512xf32>
    %18 = math.exp %17 : vector<8x512xf32>
    %cst_11 = arith.constant 1.000000e+00 : f32
    %19 = vector.broadcast %cst_11 : f32 to vector<8x512xf32>
    %20 = arith.addf %19, %18 : vector<8x512xf32>
    %21 = arith.divf %19, %20 : vector<8x512xf32>
    %22 = arith.mulf %16, %21 : vector<8x512xf32>
    %c0_12 = arith.constant 0 : index
    %c0_13 = arith.constant 0 : index
    %23 = vector.load %arg6[%c0_12, %c0_13] : memref<512x128xf32, #tpu.memory_space<vmem>>, vector<512x128xf32>
    %cst_14 = arith.constant dense<0.000000e+00> : vector<8x128xf32>
    %24 = tpu.matmul %22, %23, %cst_14 {dimension_numbers = #tpu.dot_dimension_numbers<[1], [0], [0], [1], [0, 0, 1, 1], [], []>} : vector<8x512xf32>, vector<512x128xf32>, vector<8x128xf32> -> vector<8x128xf32>
    %c0_15 = arith.constant 0 : index
    %c0_16 = arith.constant 0 : index
    %25 = vector.load %arg7[%c0_15, %c0_16] : memref<1x128xf32, #tpu.memory_space<vmem>>, vector<1x128xf32>
    %26 = vector.broadcast %25 : vector<1x128xf32> to vector<8x128xf32>
    %27 = arith.addf %24, %26 : vector<8x128xf32>
    %c0_17 = arith.constant 0 : index
    %c0_18 = arith.constant 0 : index
    %28 = vector.load %arg8[%c0_17, %c0_18] : memref<8x128xf32, #tpu.memory_space<vmem>>, vector<8x128xf32>
    tpu.vector_store %arg8[%c0_17, %c0_18], %27 {strides = array<i32>} : memref<8x128xf32, #tpu.memory_space<vmem>>, vector<8x128xf32>,
    return
  }
  func.func @transform_0(%arg0: i32) -> (i32, i32) {
    %c0_i32 = arith.constant 0 : i32
    %c0_i32_0 = arith.constant 0 : i32
    return %arg0, %c0_i32 : i32, i32
  }
  func.func @transform_1(%arg0: i32) -> (i32, i32) {
    %c0_i32 = arith.constant 0 : i32
    %c0_i32_0 = arith.constant 0 : i32
    %c0_i32_1 = arith.constant 0 : i32
    return %c0_i32, %c0_i32_0 : i32, i32
  }
  func.func @transform_2(%arg0: i32) -> (i32, i32) {
    %c0_i32 = arith.constant 0 : i32
    %c0_i32_0 = arith.constant 0 : i32
    %c0_i32_1 = arith.constant 0 : i32
    return %c0_i32, %c0_i32_0 : i32, i32
  }
  func.func @transform_3(%arg0: i32) -> (i32, i32) {
    %c0_i32 = arith.constant 0 : i32
    %c0_i32_0 = arith.constant 0 : i32
    %c0_i32_1 = arith.constant 0 : i32
    return %c0_i32, %c0_i32_0 : i32, i32
  }
  func.func @transform_4(%arg0: i32) -> (i32, i32) {
    %c0_i32 = arith.constant 0 : i32
    %c0_i32_0 = arith.constant 0 : i32
    %c0_i32_1 = arith.constant 0 : i32
    return %c0_i32, %c0_i32_0 : i32, i32
  }
  func.func @transform_5(%arg0: i32) -> (i32, i32) {
    %c0_i32 = arith.constant 0 : i32
    %c0_i32_0 = arith.constant 0 : i32
    %c0_i32_1 = arith.constant 0 : i32
    return %c0_i32, %c0_i32_0 : i32, i32
  }
  func.func @transform_6(%arg0: i32) -> (i32, i32) {
    %c0_i32 = arith.constant 0 : i32
    %c0_i32_0 = arith.constant 0 : i32
    %c0_i32_1 = arith.constant 0 : i32
    return %c0_i32, %c0_i32_0 : i32, i32
  }
  func.func @transform_7(%arg0: i32) -> (i32, i32) {
    %c0_i32 = arith.constant 0 : i32
    %c0_i32_0 = arith.constant 0 : i32
    return %arg0, %c0_i32 : i32, i32
  }
}

</mosaic_0001>

<bundles_post_ra>
// kernel: tpu_custom_call.1
= control target key start
LH: loop header
LB: loop body
LE: loop exit
PB: predicated region body
PF: predicated region fallthrough
CT: control target
= control target key end

     0   :  { %12 = vsyncpa [#allocation3], 0  ;;  %s1955_s0 = inlined_call_operand.hbm [shape: f32[8,128], index: 0, kind: input, shape index: {}]   ;;  %s1956_s1 = inlined_call_operand.hbm [shape: f32[128,512], index: 1, kind: input, shape index: {}]   ;;  %s1957_s2 = inlined_call_operand.vmem [shape: f32[1,512], index: 2, kind: input, shape index: {}]   ;;  %s1958_s3 = inlined_call_operand.hbm [shape: f32[512,512], index: 3, kind: input, shape index: {}]   ;;  %s1959_s4 = inlined_call_operand.vmem [shape: f32[1,512], index: 4, kind: input, shape index: {}]   ;;  %s1960_s5 = inlined_call_operand.hbm [shape: f32[512,128], index: 5, kind: input, shape index: {}]   ;;  %s1961_s6 = inlined_call_operand.vmem [shape: f32[1,128], index: 6, kind: input, shape index: {}]   ;;  %s1962_s7 = inlined_call_operand.hbm [shape: f32[8,128], index: 7, kind: output, shape index: {}]  }
   0x1   :  { %13 = vsyncpa [#allocation6], 0 }
   0x2   :  { %14 = vsyncpa [#allocation9], 0 }
   0x3   :  { %15 = vsyncpa [#allocation4], 0  ;;  %s1787_s24 = smov [#allocation5]   ;;  %s1669_s28 = scalar_lea.hbm %s1956_s1, 8192 }
   0x4   :  { %s31_s25 = sshll.u32 %s1787_s24, 4  ;;  %p1670_p0 = scmp.ne.s32.totalorder %s1956_s1, %s1669_s28  ;;  %s32_s25 = int_to_ptr.vmem [resolvable:$true] %s31_s25 }
   0x5   :  { %p1673_p1 = scmp.lt.u32.totalorder %s1669_s28, %s1956_s1 }
   0x7   :  { %p1675_p2 = pnand %p1673_p1, %p1670_p0 }
   0x9   :  { %1678 = shalt.err (!%p1675_p2)
}
   0xa   :  { %s1679_s10 = scalar_lea.vmem %s32_s25, 8192  ;;  %p1684_p4 = scmp.lt.s32.totalorder %s32_s25, %s32_s25 }
   0xb   :  { %p1680_p3 = scmp.ne.s32.totalorder %s32_s25, %s1679_s10  ;;  %p1685_p5 = scmp.lt.s32.totalorder %s1679_s10, %s1679_s10 }
   0xd   :  { %p1686_p6 = por %p1685_p5, %p1684_p4 }
   0xf   :  { %p1687_p7 = pnand %p1686_p6, %p1680_p3 }
  0x11   :  { %1690 = shalt.err (!%p1687_p7)
}
  0x12   :  { %s1788_s11 = smov 512   ;;  %s1789_s12 = smov 32  }
  0x13   :  { %37 = dma.hbm_to_vmem [thread:$0]  %s1956_s1, 8192, %s32_s25, [#allocation6], %s1788_s11, %s1788_s11, %s1789_s12  }
  0x14   :  { %s1790_s15 = smov [#allocation2]   ;;  %s1791_s17 = smov [#allocation7]  }
  0x15   :  { %s22_s16 = sshll.u32 %s1790_s15, 4  ;;  %s45_s18 = sshll.u32 %s1791_s17, 4  ;;  %s23_s16 = int_to_ptr.vmem [resolvable:$true] %s22_s16  ;;  %s46_s18 = int_to_ptr.vmem [resolvable:$true] %s45_s18 }
  0x16   :  { %s1691_s21 = scalar_lea.hbm %s1955_s0, 128 }
  0x17   :  { %p1692_p8 = scmp.ne.s32.totalorder %s1955_s0, %s1691_s21  ;;  %p1695_p9 = scmp.lt.u32.totalorder %s1691_s21, %s1955_s0 }
  0x19   :  { %p1697_p10 = pnand %p1695_p9, %p1692_p8 }
  0x1b   :  { %1700 = shalt.err (!%p1697_p10)
}
  0x1c   :  { %s1701_s1 = scalar_lea.vmem %s23_s16, 128  ;;  %p1706_p12 = scmp.lt.s32.totalorder %s23_s16, %s23_s16 }
  0x1d   :  { %p1702_p11 = scmp.ne.s32.totalorder %s23_s16, %s1701_s1  ;;  %p1707_p13 = scmp.lt.s32.totalorder %s1701_s1, %s1701_s1 }
  0x1f   :  { %p1708_p0 = por %p1707_p13, %p1706_p12 }
  0x21   :  { %p1709_p1 = pnand %p1708_p0, %p1702_p11 }
  0x23   :  { %1712 = shalt.err (!%p1709_p1)
}
  0x24   :  { %25 = dma.hbm_to_vmem [thread:$0]  %s1955_s0, 128, %s23_s16, [#allocation3]  }
  0x25   :  { %s1713_s30 = scalar_lea.hbm %s1958_s3, 32768 }
  0x26   :  { %p1714_p2 = scmp.ne.s32.totalorder %s1958_s3, %s1713_s30  ;;  %p1717_p3 = scmp.lt.u32.totalorder %s1713_s30, %s1958_s3 }
  0x28   :  { %p1719_p4 = pnand %p1717_p3, %p1714_p2 }
  0x2a   :  { %1722 = shalt.err (!%p1719_p4)
}
  0x2b   :  { %s1723_s14 = scalar_lea.vmem %s46_s18, 32768  ;;  %p1728_p6 = scmp.lt.s32.totalorder %s46_s18, %s46_s18 }
  0x2c   :  { %p1724_p5 = scmp.ne.s32.totalorder %s46_s18, %s1723_s14  ;;  %p1729_p7 = scmp.lt.s32.totalorder %s1723_s14, %s1723_s14 }
  0x2e   :  { %p1730_p8 = por %p1729_p7, %p1728_p6 }
  0x30   :  { %p1731_p9 = pnand %p1730_p8, %p1724_p5 }
  0x32   :  { %1734 = shalt.err (!%p1731_p9)
}
  0x33   :  { %51 = dma.hbm_to_vmem [thread:$0]  %s1958_s3, 32768, %s46_s18, [#allocation6], %s1788_s11, %s1788_s11, %s1789_s12  }
  0x34   :  { %s1792_s16 = smov [#allocation8]   ;;  %s1735_s21 = scalar_lea.hbm %s1960_s5, 8192 }
  0x35   :  { %s59_s17 = sshll.u32 %s1792_s16, 4  ;;  %p1736_p10 = scmp.ne.s32.totalorder %s1960_s5, %s1735_s21  ;;  %s60_s17 = int_to_ptr.vmem [resolvable:$true] %s59_s17 }
  0x36   :  { %p1739_p11 = scmp.lt.u32.totalorder %s1735_s21, %s1960_s5 }
  0x38   :  { %p1741_p12 = pnand %p1739_p11, %p1736_p10 }
  0x3a   :  { %1744 = shalt.err (!%p1741_p12)
}
  0x3b   :  { %s1745_s1 = scalar_lea.vmem %s60_s17, 8192  ;;  %p1750_p0 = scmp.lt.s32.totalorder %s60_s17, %s60_s17 }
  0x3c   :  { %p1746_p13 = scmp.ne.s32.totalorder %s60_s17, %s1745_s1  ;;  %p1751_p1 = scmp.lt.s32.totalorder %s1745_s1, %s1745_s1 }
  0x3e   :  { %p1752_p2 = por %p1751_p1, %p1750_p0 }
  0x40   :  { %p1753_p3 = pnand %p1752_p2, %p1746_p13 }
  0x42   :  { %1756 = shalt.err (!%p1753_p3)
}
  0x43   :  { %s1793_s3 = smov 128   ;;  %s1794_s11 = smov 8  }
  0x44   :  { %65 = dma.hbm_to_vmem [thread:$0]  %s1960_s5, 8192, %s60_s17, [#allocation9], %s1793_s3, %s1793_s3, %s1794_s11  }
  0x45   :  { %1779 = dma.done.wait [#allocation3], 128  }
  0x46   :  { %1780 = vsyncadd [#allocation3], 4294967168 }
  0x47   :  { %1781 = dma.done.wait [#allocation6], 40960  }
  0x48   :  { %1782 = vsyncadd [#allocation6], 4294926336 }
  0x49   :  { %1783 = dma.done.wait [#allocation9], 8192  }
  0x4a   :  { %1784 = vsyncadd [#allocation9], 4294959104  ;;  %v1795_v0 = vmov 0.0   ;;  %v82_v1 = vld [vmem:[#allocation5 + $0x8] sm:$0xff]  ;;  %v81_v3 = vld [vmem:[#allocation5] sm:$0xff]  ;;  %s1796_s29 = smov [#allocation10]  }
  0x4b   :  { %231 = vmatprep.mubr.f32.mxu0 %v1795_v0  ;;  %302 = vmatprep.mubr.f32.mxu1 %v1795_v0  ;;  %v86_v2 = vld [vmem:[#allocation5 + $0x28] sm:$0xff]  ;;  %v85_v5 = vld [vmem:[#allocation5 + $0x20] sm:$0xff]  ;;  %v84_v28 = vld [vmem:[#allocation5 + $0x18] sm:$0xff]  ;;  %s1145_s30 = sshll.u32 %s1796_s29, 4  ;;  %s1146_s30 = int_to_ptr.vmem [resolvable:$true] %s1145_s30 }
  0x4c   :  { %v1235_v4 = vpack.c.bf16 %v86_v2, %v82_v1  ;;  %v90_v6 = vld [vmem:[#allocation5 + $0x48] sm:$0xff]  ;;  %v1237_v8 = vpack.c.bf16 %v85_v5, %v81_v3  ;;  %v89_v10 = vld [vmem:[#allocation5 + $0x40] sm:$0xff]  ;;  %v88_v29 = vld [vmem:[#allocation5 + $0x38] sm:$0xff]  ;;  %s1757_s8 = scalar_lea.vmem %s1146_s30, 128  ;;  %p1762_p5 = scmp.lt.s32.totalorder %s1146_s30, %s1146_s30 }
  0x4d   :  { %v94_v7 = vld [vmem:[#allocation5 + $0x68] sm:$0xff]  ;;  %v93_v11 = vld [vmem:[#allocation5 + $0x60] sm:$0xff]  ;;  %v83_v30 = vld [vmem:[#allocation5 + $0x10] sm:$0xff]  ;;  %v1267_v32 = vpack.c.bf16 %v88_v29, %v84_v28  ;;  %p1758_p4 = scmp.ne.s32.totalorder %s1146_s30, %s1757_s8  ;;  %p1763_p6 = scmp.lt.s32.totalorder %s1757_s8, %s1757_s8 }
  0x4e   :  { %v1239_v9 = vpack.c.bf16 %v94_v7, %v90_v6  ;;  %v98_v12 = vld [vmem:[#allocation5 + $0x88] sm:$0xff]  ;;  %1236 = vmatprep.subr.bf16.mxu0 %v1235_v4  ;;  %v1241_v14 = vpack.c.bf16 %v93_v11, %v89_v10  ;;  %v97_v16 = vld [vmem:[#allocation5 + $0x80] sm:$0xff]  ;;  %v87_v33 = vld [vmem:[#allocation5 + $0x30] sm:$0xff] }
  0x4f   :  { %v102_v13 = vld [vmem:[#allocation5 + $0xa8] sm:$0xff]  ;;  %1238 = vmatpush1.bf16.msra.mxu0 %v1237_v8  ;;  %v101_v17 = vld [vmem:[#allocation5 + $0xa0] sm:$0xff]  ;;  %v92_v34 = vld [vmem:[#allocation5 + $0x58] sm:$0xff]  ;;  %v1269_v37 = vpack.c.bf16 %v87_v33, %v83_v30  ;;  %1268 = vmatprep.subr.bf16.mxu1 %v1267_v32  ;;  %p1764_p7 = por %p1763_p6, %p1762_p5 }
  0x50   :  { %1240 = vmatprep.subr.bf16.mxu0 %v1239_v9  ;;  %v1243_v15 = vpack.c.bf16 %v102_v13, %v98_v12  ;;  %v106_v18 = vld [vmem:[#allocation5 + $0xc8] sm:$0xff]  ;;  %v1245_v20 = vpack.c.bf16 %v101_v17, %v97_v16  ;;  %v105_v22 = vld [vmem:[#allocation5 + $0xc0] sm:$0xff]  ;;  %v96_v35 = vld [vmem:[#allocation5 + $0x78] sm:$0xff] }
  0x51   :  { %v110_v19 = vld [vmem:[#allocation5 + $0xe8] sm:$0xff]  ;;  %v109_v23 = vld [vmem:[#allocation5 + $0xe0] sm:$0xff]  ;;  %v1271_v38 = vpack.c.bf16 %v96_v35, %v92_v34  ;;  %v91_v39 = vld [vmem:[#allocation5 + $0x50] sm:$0xff]  ;;  %1270 = vmatpush1.bf16.msra.mxu1 %v1269_v37  ;;  %p1765_p8 = pnand %p1764_p7, %p1758_p4 }
  0x52   :  { %v1247_v21 = vpack.c.bf16 %v110_v19, %v106_v18  ;;  %v114_v24 = vld [vmem:[#allocation5 + $0x108] sm:$0xff]  ;;  %v113_v26 = vld [vmem:[#allocation5 + $0x100] sm:$0xff]  ;;  %v1249_v31 = vpack.c.bf16 %v109_v23, %v105_v22  ;;  %v95_v40 = vld [vmem:[#allocation5 + $0x70] sm:$0xff] }
  0x53   :  { %1242 = vmatpush1.bf16.msra.mxu0 %v1241_v14  ;;  %v118_v25 = vld [vmem:[#allocation5 + $0x128] sm:$0xff]  ;;  %v117_v27 = vld [vmem:[#allocation5 + $0x120] sm:$0xff]  ;;  %v100_v41 = vld [vmem:[#allocation5 + $0x98] sm:$0xff]  ;;  %v1273_v45 = vpack.c.bf16 %v95_v40, %v91_v39  ;;  %1272 = vmatprep.subr.bf16.mxu1 %v1271_v38 }
  0x54   :  { %1244 = vmatprep.subr.bf16.mxu0 %v1243_v15  ;;  %v1251_v36 = vpack.c.bf16 %v118_v25, %v114_v24  ;;  %v122_v42 = vld [vmem:[#allocation5 + $0x148] sm:$0xff]  ;;  %v104_v44 = vld [vmem:[#allocation5 + $0xb8] sm:$0xff]  ;;  %v1253_v46 = vpack.c.bf16 %v117_v27, %v113_v26  ;;  %v121_v47 = vld [vmem:[#allocation5 + $0x140] sm:$0xff] }
  0x55   :  { %v126_v43 = vld [vmem:[#allocation5 + $0x168] sm:$0xff]  ;;  %v1275_v48 = vpack.c.bf16 %v104_v44, %v100_v41  ;;  %v99_v49 = vld [vmem:[#allocation5 + $0x90] sm:$0xff]  ;;  %v125_v52 = vld [vmem:[#allocation5 + $0x160] sm:$0xff]  ;;  %1274 = vmatpush1.bf16.msra.mxu1 %v1273_v45 }
  0x56   :  { %v103_v50 = vld [vmem:[#allocation5 + $0xb0] sm:$0xff]  ;;  %v1255_v51 = vpack.c.bf16 %v126_v43, %v122_v42  ;;  %v108_v53 = vld [vmem:[#allocation5 + $0xd8] sm:$0xff]  ;;  %v130_v55 = vld [vmem:[#allocation5 + $0x188] sm:$0xff]  ;;  %v1257_v58 = vpack.c.bf16 %v125_v52, %v121_v47 }
  0x57   :  { %1246 = vmatpush1.bf16.msra.mxu0 %v1245_v20  ;;  %v112_v54 = vld [vmem:[#allocation5 + $0xf8] sm:$0xff]  ;;  %v134_v56 = vld [vmem:[#allocation5 + $0x1a8] sm:$0xff]  ;;  %v1277_v57 = vpack.c.bf16 %v103_v50, %v99_v49  ;;  %v129_v59 = vld [vmem:[#allocation5 + $0x180] sm:$0xff]  ;;  %1276 = vmatprep.subr.bf16.mxu1 %v1275_v48 }
  0x58   :  { %1248 = vmatprep.subr.bf16.mxu0 %v1247_v21  ;;  %v1279_v60 = vpack.c.bf16 %v112_v54, %v108_v53  ;;  %v107_v61 = vld [vmem:[#allocation5 + $0xd0] sm:$0xff]  ;;  %v1259_v63 = vpack.c.bf16 %v134_v56, %v130_v55  ;;  %v133_v0 = vld [vmem:[#allocation5 + $0x1a0] sm:$0xff]  ;;  %v116_v1 = vld [vmem:[#allocation5 + $0x118] sm:$0xff] }
  0x59   :  { %v111_v62 = vld [vmem:[#allocation5 + $0xf0] sm:$0xff]  ;;  %v120_v2 = vld [vmem:[#allocation5 + $0x138] sm:$0xff]  ;;  %v138_v3 = vld [vmem:[#allocation5 + $0x1c8] sm:$0xff]  ;;  %1278 = vmatpush1.bf16.msra.mxu1 %v1277_v57  ;;  %v1261_v6 = vpack.c.bf16 %v133_v0, %v129_v59 }
  0x5a   :  { %v142_v4 = vld [vmem:[#allocation5 + $0x1e8] sm:$0xff]  ;;  %v1281_v5 = vpack.c.bf16 %v111_v62, %v107_v61  ;;  %v137_v7 = vld [vmem:[#allocation5 + $0x1c0] sm:$0xff]  ;;  %1280 = vmatprep.subr.bf16.mxu1 %v1279_v60  ;;  %v1283_v8 = vpack.c.bf16 %v120_v2, %v116_v1  ;;  %v115_v9 = vld [vmem:[#allocation5 + $0x110] sm:$0xff] }
  0x5b   :  { %1250 = vmatpush1.bf16.msra.mxu0 %v1249_v31  ;;  %v119_v10 = vld [vmem:[#allocation5 + $0x130] sm:$0xff]  ;;  %v1263_v11 = vpack.c.bf16 %v142_v4, %v138_v3  ;;  %v141_v12 = vld [vmem:[#allocation5 + $0x1e0] sm:$0xff]  ;;  %v124_v13 = vld [vmem:[#allocation5 + $0x158] sm:$0xff] }
  0x5c   :  { %1252 = vmatprep.subr.bf16.mxu0 %v1251_v36  ;;  %v128_v14 = vld [vmem:[#allocation5 + $0x178] sm:$0xff]  ;;  %v338_v15 = vld [vmem:[#allocation7 + $0x8] sm:$0xff]  ;;  %v1285_v17 = vpack.c.bf16 %v119_v10, %v115_v9  ;;  %v1265_v18 = vpack.c.bf16 %v141_v12, %v137_v7  ;;  %v123_v20 = vld [vmem:[#allocation5 + $0x150] sm:$0xff] }
  0x5d   :  { %v342_v16 = vld [vmem:[#allocation7 + $0x28] sm:$0xff]  ;;  %1282 = vmatpush1.bf16.msra.mxu1 %v1281_v5  ;;  %v1287_v19 = vpack.c.bf16 %v128_v14, %v124_v13  ;;  %v127_v21 = vld [vmem:[#allocation5 + $0x170] sm:$0xff]  ;;  %v132_v22 = vld [vmem:[#allocation5 + $0x198] sm:$0xff] }
  0x5e   :  { %1284 = vmatprep.subr.bf16.mxu1 %v1283_v8  ;;  %v136_v23 = vld [vmem:[#allocation5 + $0x1b8] sm:$0xff]  ;;  %v1299_v24 = vpack.c.bf16 %v342_v16, %v338_v15  ;;  %v337_v25 = vld [vmem:[#allocation7] sm:$0xff]  ;;  %v346_v27 = vld [vmem:[#allocation7 + $0x48] sm:$0xff]  ;;  %v1289_v30 = vpack.c.bf16 %v127_v21, %v123_v20 }
  0x5f   :  { %1254 = vmatpush1.bf16.msra.mxu0 %v1253_v46  ;;  %v341_v26 = vld [vmem:[#allocation7 + $0x20] sm:$0xff]  ;;  %v350_v28 = vld [vmem:[#allocation7 + $0x68] sm:$0xff]  ;;  %v1891_v29 = vld [vmem:[#allocation2] sm:$0xff]  ;;  %v1291_v31 = vpack.c.bf16 %v136_v23, %v132_v22 }
  0x60   :  { %1256 = vmatprep.subr.bf16.mxu0 %v1255_v51  ;;  %v131_v32 = vld [vmem:[#allocation5 + $0x190] sm:$0xff]  ;;  %v140_v34 = vld [vmem:[#allocation5 + $0x1d8] sm:$0xff]  ;;  %v1301_v35 = vpack.c.bf16 %v341_v26, %v337_v25  ;;  %v1303_v37 = vpack.c.bf16 %v350_v28, %v346_v27  ;;  %v345_v38 = vld [vmem:[#allocation7 + $0x40] sm:$0xff] }
  0x61   :  { %1286 = vmatpush1.bf16.msra.mxu1 %v1285_v17  ;;  %v135_v33 = vld [vmem:[#allocation5 + $0x1b0] sm:$0xff]  ;;  %v144_v36 = vld [vmem:[#allocation5 + $0x1f8] sm:$0xff]  ;;  %v349_v39 = vld [vmem:[#allocation7 + $0x60] sm:$0xff] }
  0x62   :  { %1288 = vmatprep.subr.bf16.mxu1 %v1287_v19  ;;  %v354_v40 = vld [vmem:[#allocation7 + $0x88] sm:$0xff]  ;;  %v1293_v42 = vpack.c.bf16 %v135_v33, %v131_v32  ;;  %v1295_v43 = vpack.c.bf16 %v144_v36, %v140_v34  ;;  %v139_v44 = vld [vmem:[#allocation5 + $0x1d0] sm:$0xff]  ;;  %v340_v46 = vld [vmem:[#allocation7 + $0x18] sm:$0xff]  ;;  %v1305_v47 = vpack.c.bf16 %v349_v39, %v345_v38 }
  0x63   :  { %1258 = vmatpush1.bf16.msra.mxu0 %v1257_v58  ;;  %v358_v41 = vld [vmem:[#allocation7 + $0xa8] sm:$0xff]  ;;  %v143_v45 = vld [vmem:[#allocation5 + $0x1f0] sm:$0xff]  ;;  %v344_v48 = vld [vmem:[#allocation7 + $0x38] sm:$0xff] }
  0x64   :  { %1260 = vmatprep.subr.bf16.mxu0 %v1259_v63  ;;  %v1307_v49 = vpack.c.bf16 %v358_v41, %v354_v40  ;;  %v353_v50 = vld [vmem:[#allocation7 + $0x80] sm:$0xff]  ;;  %v362_v52 = vld [vmem:[#allocation7 + $0xc8] sm:$0xff]  ;;  %v1297_v54 = vpack.c.bf16 %v143_v45, %v139_v44  ;;  %v1427_v55 = vpack.c.bf16 %v344_v48, %v340_v46  ;;  %v339_v56 = vld [vmem:[#allocation7 + $0x10] sm:$0xff] }
  0x65   :  { %1290 = vmatpush1.bf16.msra.mxu1 %v1289_v30  ;;  %v357_v51 = vld [vmem:[#allocation7 + $0xa0] sm:$0xff]  ;;  %v366_v53 = vld [vmem:[#allocation7 + $0xe8] sm:$0xff]  ;;  %v343_v57 = vld [vmem:[#allocation7 + $0x30] sm:$0xff] }
  0x66   :  { %1292 = vmatprep.subr.bf16.mxu1 %v1291_v31  ;;  %v348_v58 = vld [vmem:[#allocation7 + $0x58] sm:$0xff]  ;;  %v1309_v59 = vpack.c.bf16 %v357_v51, %v353_v50  ;;  %v1311_v61 = vpack.c.bf16 %v366_v53, %v362_v52  ;;  %v361_v62 = vld [vmem:[#allocation7 + $0xc0] sm:$0xff]  ;;  %v370_v0 = vld [vmem:[#allocation7 + $0x108] sm:$0xff]  ;;  %v1429_v2 = vpack.c.bf16 %v343_v57, %v339_v56 }
  0x67   :  { %1262 = vmatpush1.bf16.msra.mxu0 %v1261_v6  ;;  %v352_v60 = vld [vmem:[#allocation7 + $0x78] sm:$0xff]  ;;  %v365_v63 = vld [vmem:[#allocation7 + $0xe0] sm:$0xff]  ;;  %v374_v1 = vld [vmem:[#allocation7 + $0x128] sm:$0xff] }
  0x68   :  { %1264 = vmatprep.subr.bf16.mxu0 %v1263_v11  ;;  %v1431_v3 = vpack.c.bf16 %v352_v60, %v348_v58  ;;  %v347_v4 = vld [vmem:[#allocation7 + $0x50] sm:$0xff]  ;;  %v356_v6 = vld [vmem:[#allocation7 + $0x98] sm:$0xff]  ;;  %v1313_v7 = vpack.c.bf16 %v365_v63, %v361_v62  ;;  %v1315_v9 = vpack.c.bf16 %v374_v1, %v370_v0  ;;  %v369_v10 = vld [vmem:[#allocation7 + $0x100] sm:$0xff] }
  0x69   :  { %1294 = vmatpush1.bf16.msra.mxu1 %v1293_v42  ;;  %v351_v5 = vld [vmem:[#allocation7 + $0x70] sm:$0xff]  ;;  %v360_v8 = vld [vmem:[#allocation7 + $0xb8] sm:$0xff]  ;;  %v373_v11 = vld [vmem:[#allocation7 + $0x120] sm:$0xff] }
  0x6a   :  { %1296 = vmatprep.subr.bf16.mxu1 %v1295_v43  ;;  %v378_v12 = vld [vmem:[#allocation7 + $0x148] sm:$0xff]  ;;  %v1433_v14 = vpack.c.bf16 %v351_v5, %v347_v4  ;;  %v1435_v15 = vpack.c.bf16 %v360_v8, %v356_v6  ;;  %v355_v16 = vld [vmem:[#allocation7 + $0x90] sm:$0xff]  ;;  %v1317_v19 = vpack.c.bf16 %v373_v11, %v369_v10  ;;  %v368_v20 = vld [vmem:[#allocation7 + $0xf8] sm:$0xff] }
  0x6b   :  { %1266 = vmatpush1.bf16.msra.mxu0 %v1265_v18  ;;  %v382_v13 = vld [vmem:[#allocation7 + $0x168] sm:$0xff]  ;;  %v359_v17 = vld [vmem:[#allocation7 + $0xb0] sm:$0xff]  ;;  %v364_v18 = vld [vmem:[#allocation7 + $0xd8] sm:$0xff] }
  0x6c   :  { %1300 = vmatprep.subr.bf16.mxu0 %v1299_v24  ;;  %v1319_v21 = vpack.c.bf16 %v382_v13, %v378_v12  ;;  %v377_v22 = vld [vmem:[#allocation7 + $0x140] sm:$0xff]  ;;  %v386_v24 = vld [vmem:[#allocation7 + $0x188] sm:$0xff]  ;;  %v1437_v26 = vpack.c.bf16 %v359_v17, %v355_v16  ;;  %v1439_v27 = vpack.c.bf16 %v368_v20, %v364_v18  ;;  %v363_v28 = vld [vmem:[#allocation7 + $0xd0] sm:$0xff] }
  0x6d   :  { %1298 = vmatpush1.bf16.msra.mxu1 %v1297_v54  ;;  %v381_v23 = vld [vmem:[#allocation7 + $0x160] sm:$0xff]  ;;  %v390_v25 = vld [vmem:[#allocation7 + $0x1a8] sm:$0xff]  ;;  %v372_v30 = vld [vmem:[#allocation7 + $0x118] sm:$0xff] }
  0x6e   :  { %232 = vmatmul.mubr.f32.vlgmr.msra.gmra.mrb[0].mxu0 %v1891_v29  ;;  %1428 = vmatprep.subr.bf16.mxu1 %v1427_v55  ;;  %v1321_v31 = vpack.c.bf16 %v381_v23, %v377_v22  ;;  %v376_v32 = vld [vmem:[#allocation7 + $0x138] sm:$0xff]  ;;  %v1323_v33 = vpack.c.bf16 %v390_v25, %v386_v24  ;;  %v385_v34 = vld [vmem:[#allocation7 + $0x180] sm:$0xff]  ;;  %v394_v36 = vld [vmem:[#allocation7 + $0x1c8] sm:$0xff] }
  0x6f   :  { %1302 = vmatpush1.bf16.msra.mxu0 %v1301_v35  ;;  %v389_v35 = vld [vmem:[#allocation7 + $0x1a0] sm:$0xff]  ;;  %v1443_v39 = vpack.c.bf16 %v376_v32, %v372_v30  ;;  %v371_v40 = vld [vmem:[#allocation7 + $0x110] sm:$0xff]  ;;  %v380_v42 = vld [vmem:[#allocation7 + $0x158] sm:$0xff] }
  0x70   :  { %1304 = vmatprep.subr.bf16.mxu0 %v1303_v37  ;;  %303 = vmatmul.mubr.f32.vlgmr.msra.gmra.mrb[0].mxu1 %v1891_v29  ;;  %v367_v29 = vld [vmem:[#allocation7 + $0xf0] sm:$0xff]  ;;  %v398_v37 = vld [vmem:[#allocation7 + $0x1e8] sm:$0xff]  ;;  %v1325_v43 = vpack.c.bf16 %v389_v35, %v385_v34  ;;  %v384_v44 = vld [vmem:[#allocation7 + $0x178] sm:$0xff] }
  0x71   :  { %1430 = vmatpush1.bf16.msra.mxu1 %v1429_v2  ;;  %v1441_v38 = vpack.c.bf16 %v367_v29, %v363_v28  ;;  %v375_v41 = vld [vmem:[#allocation7 + $0x130] sm:$0xff]  ;;  %v1327_v45 = vpack.c.bf16 %v398_v37, %v394_v36  ;;  %v393_v46 = vld [vmem:[#allocation7 + $0x1c0] sm:$0xff]  ;;  %v388_v53 = vld [vmem:[#allocation7 + $0x198] sm:$0xff] }
  0x72   :  { %1432 = vmatprep.subr.bf16.mxu1 %v1431_v3  ;;  %v1445_v48 = vpack.c.bf16 %v375_v41, %v371_v40  ;;  %v379_v50 = vld [vmem:[#allocation7 + $0x150] sm:$0xff]  ;;  %v392_v54 = vld [vmem:[#allocation7 + $0x1b8] sm:$0xff]  ;;  %v402_v2 = vld [vmem:[#allocation7 + $0x208] sm:$0xff] }
  0x73   :  { %1306 = vmatpush1.bf16.msra.mxu0 %v1305_v47  ;;  %v397_v47 = vld [vmem:[#allocation7 + $0x1e0] sm:$0xff]  ;;  %v383_v51 = vld [vmem:[#allocation7 + $0x170] sm:$0xff]  ;;  %v1451_v56 = vpack.c.bf16 %v392_v54, %v388_v53  ;;  %v400_v60 = vld [vmem:[#allocation7 + $0x1f8] sm:$0xff] }
  0x74   :  { %1308 = vmatprep.subr.bf16.mxu0 %v1307_v49  ;;  %v1447_v49 = vpack.c.bf16 %v384_v44, %v380_v42  ;;  %v1329_v52 = vpack.c.bf16 %v397_v47, %v393_v46  ;;  %v1449_v55 = vpack.c.bf16 %v383_v51, %v379_v50  ;;  %v387_v57 = vld [vmem:[#allocation7 + $0x190] sm:$0xff]  ;;  %v406_v3 = vld [vmem:[#allocation7 + $0x228] sm:$0xff]  ;;  %v404_v4 = vld [vmem:[#allocation7 + $0x218] sm:$0xff] }
  0x75   :  { %1434 = vmatpush1.bf16.msra.mxu1 %v1433_v14  ;;  %v391_v58 = vld [vmem:[#allocation7 + $0x1b0] sm:$0xff]  ;;  %v1331_v5 = vpack.c.bf16 %v406_v3, %v402_v2  ;;  %v408_v6 = vld [vmem:[#allocation7 + $0x238] sm:$0xff]  ;;  %v405_v8 = vld [vmem:[#allocation7 + $0x220] sm:$0xff] }
  0x76   :  { %1436 = vmatprep.subr.bf16.mxu1 %v1435_v15  ;;  %v395_v63 = vld [vmem:[#allocation7 + $0x1d0] sm:$0xff]  ;;  %v410_v14 = vld [vmem:[#allocation7 + $0x248] sm:$0xff]  ;;  %v412_v16 = vld [vmem:[#allocation7 + $0x258] sm:$0xff] }
  0x77   :  { %1310 = vmatpush1.bf16.msra.mxu0 %v1309_v59  ;;  %v396_v59 = vld [vmem:[#allocation7 + $0x1d8] sm:$0xff]  ;;  %v399_v0 = vld [vmem:[#allocation7 + $0x1f0] sm:$0xff]  ;;  %v414_v15 = vld [vmem:[#allocation7 + $0x268] sm:$0xff] }
  0x78   :  { %1312 = vmatprep.subr.bf16.mxu0 %v1311_v61  ;;  %v1453_v61 = vpack.c.bf16 %v391_v58, %v387_v57  ;;  %v1455_v62 = vpack.c.bf16 %v400_v60, %v396_v59  ;;  %v1457_v1 = vpack.c.bf16 %v399_v0, %v395_v63  ;;  %v403_v11 = vld [vmem:[#allocation7 + $0x210] sm:$0xff]  ;;  %v1335_v17 = vpack.c.bf16 %v414_v15, %v410_v14  ;;  %v416_v18 = vld [vmem:[#allocation7 + $0x278] sm:$0xff]  ;;  %v413_v20 = vld [vmem:[#allocation7 + $0x260] sm:$0xff] }
  0x79   :  { %1438 = vmatpush1.bf16.msra.mxu1 %v1437_v26  ;;  %v407_v12 = vld [vmem:[#allocation7 + $0x230] sm:$0xff]  ;;  %v418_v26 = vld [vmem:[#allocation7 + $0x288] sm:$0xff]  ;;  %v420_v28 = vld [vmem:[#allocation7 + $0x298] sm:$0xff] }
  0x7a   :  { %1440 = vmatprep.subr.bf16.mxu1 %v1439_v27  ;;  %v1461_v13 = vpack.c.bf16 %v407_v12, %v403_v11  ;;  %v411_v23 = vld [vmem:[#allocation7 + $0x250] sm:$0xff]  ;;  %v422_v27 = vld [vmem:[#allocation7 + $0x2a8] sm:$0xff]  ;;  %v424_v30 = vld [vmem:[#allocation7 + $0x2b8] sm:$0xff] }
  0x7b   :  { %1314 = vmatpush1.bf16.msra.mxu0 %v1313_v7  ;;  %v401_v7 = vld [vmem:[#allocation7 + $0x200] sm:$0xff]  ;;  %v415_v24 = vld [vmem:[#allocation7 + $0x270] sm:$0xff]  ;;  %v1339_v29 = vpack.c.bf16 %v422_v27, %v418_v26  ;;  %v428_v40 = vld [vmem:[#allocation7 + $0x2d8] sm:$0xff] }
  0x7c   :  { %1316 = vmatprep.subr.bf16.mxu0 %v1315_v9  ;;  %v1459_v9 = vpack.c.bf16 %v408_v6, %v404_v4  ;;  %v1333_v10 = vpack.c.bf16 %v405_v8, %v401_v7  ;;  %v1465_v25 = vpack.c.bf16 %v415_v24, %v411_v23  ;;  %v421_v32 = vld [vmem:[#allocation7 + $0x2a0] sm:$0xff]  ;;  %v419_v35 = vld [vmem:[#allocation7 + $0x290] sm:$0xff]  ;;  %v432_v42 = vld [vmem:[#allocation7 + $0x2f8] sm:$0xff] }
  0x7d   :  { %1442 = vmatpush1.bf16.msra.mxu1 %v1441_v38  ;;  %v423_v36 = vld [vmem:[#allocation7 + $0x2b0] sm:$0xff]  ;;  %v426_v38 = vld [vmem:[#allocation7 + $0x2c8] sm:$0xff]  ;;  %v429_v44 = vld [vmem:[#allocation7 + $0x2e0] sm:$0xff] }
  0x7e   :  { %1444 = vmatprep.subr.bf16.mxu1 %v1443_v39  ;;  %v1469_v37 = vpack.c.bf16 %v423_v36, %v419_v35  ;;  %v430_v39 = vld [vmem:[#allocation7 + $0x2e8] sm:$0xff]  ;;  %v427_v47 = vld [vmem:[#allocation7 + $0x2d0] sm:$0xff]  ;;  %v440_v54 = vld [vmem:[#allocation7 + $0x338] sm:$0xff] }
  0x7f   :  { %1318 = vmatpush1.bf16.msra.mxu0 %v1317_v19  ;;  %v409_v19 = vld [vmem:[#allocation7 + $0x240] sm:$0xff]  ;;  %v1343_v41 = vpack.c.bf16 %v430_v39, %v426_v38  ;;  %v434_v50 = vld [vmem:[#allocation7 + $0x308] sm:$0xff]  ;;  %v435_v59 = vld [vmem:[#allocation7 + $0x310] sm:$0xff] }
  0x80   :  { %1320 = vmatprep.subr.bf16.mxu0 %v1319_v21  ;;  %v1463_v21 = vpack.c.bf16 %v416_v18, %v412_v16  ;;  %v1337_v22 = vpack.c.bf16 %v413_v20, %v409_v19  ;;  %v438_v51 = vld [vmem:[#allocation7 + $0x328] sm:$0xff]  ;;  %v439_v60 = vld [vmem:[#allocation7 + $0x330] sm:$0xff]  ;;  %v444_v0 = vld [vmem:[#allocation7 + $0x358] sm:$0xff] }
  0x81   :  { %1446 = vmatpush1.bf16.msra.mxu1 %v1445_v48  ;;  %v431_v48 = vld [vmem:[#allocation7 + $0x2f0] sm:$0xff]  ;;  %v1347_v53 = vpack.c.bf16 %v438_v51, %v434_v50  ;;  %v446_v63 = vld [vmem:[#allocation7 + $0x368] sm:$0xff]  ;;  %v448_v2 = vld [vmem:[#allocation7 + $0x378] sm:$0xff] }
  0x82   :  { %1448 = vmatprep.subr.bf16.mxu1 %v1447_v49  ;;  %v1473_v49 = vpack.c.bf16 %v431_v48, %v427_v47  ;;  %v441_v3 = vld [vmem:[#allocation7 + $0x340] sm:$0xff]  ;;  %v443_v7 = vld [vmem:[#allocation7 + $0x350] sm:$0xff]  ;;  %v454_v11 = vld [vmem:[#allocation7 + $0x3a8] sm:$0xff] }
  0x83   :  { %1322 = vmatpush1.bf16.msra.mxu0 %v1321_v31  ;;  %v417_v31 = vld [vmem:[#allocation7 + $0x280] sm:$0xff]  ;;  %v447_v8 = vld [vmem:[#allocation7 + $0x370] sm:$0xff]  ;;  %v452_v12 = vld [vmem:[#allocation7 + $0x398] sm:$0xff] }
  0x84   :  { %1324 = vmatprep.subr.bf16.mxu0 %v1323_v33  ;;  %v1467_v33 = vpack.c.bf16 %v424_v30, %v420_v28  ;;  %v1341_v34 = vpack.c.bf16 %v421_v32, %v417_v31  ;;  %v445_v4 = vld [vmem:[#allocation7 + $0x360] sm:$0xff]  ;;  %v456_v14 = vld [vmem:[#allocation7 + $0x3b8] sm:$0xff]  ;;  %v451_v19 = vld [vmem:[#allocation7 + $0x390] sm:$0xff] }
  0x85   :  { %1450 = vmatpush1.bf16.msra.mxu1 %v1449_v55  ;;  %v433_v55 = vld [vmem:[#allocation7 + $0x300] sm:$0xff]  ;;  %v1353_v6 = vpack.c.bf16 %v445_v4, %v441_v3  ;;  %v455_v20 = vld [vmem:[#allocation7 + $0x3b0] sm:$0xff]  ;;  %v462_v23 = vld [vmem:[#allocation7 + $0x3e8] sm:$0xff] }
  0x86   :  { %1452 = vmatprep.subr.bf16.mxu1 %v1451_v56  ;;  %v437_v56 = vld [vmem:[#allocation7 + $0x320] sm:$0xff]  ;;  %v460_v24 = vld [vmem:[#allocation7 + $0x3d8] sm:$0xff]  ;;  %v459_v31 = vld [vmem:[#allocation7 + $0x3d0] sm:$0xff] }
  0x87   :  { %1326 = vmatpush1.bf16.msra.mxu0 %v1325_v43  ;;  %v425_v43 = vld [vmem:[#allocation7 + $0x2c0] sm:$0xff]  ;;  %v1349_v58 = vpack.c.bf16 %v437_v56, %v433_v55  ;;  %v464_v26 = vld [vmem:[#allocation7 + $0x3f8] sm:$0xff]  ;;  %v463_v32 = vld [vmem:[#allocation7 + $0x3f0] sm:$0xff] }
  0x88   :  { %1328 = vmatprep.subr.bf16.mxu0 %v1327_v45  ;;  %v1471_v45 = vpack.c.bf16 %v432_v42, %v428_v40  ;;  %v1345_v46 = vpack.c.bf16 %v429_v44, %v425_v43  ;;  %v449_v15 = vld [vmem:[#allocation7 + $0x380] sm:$0xff]  ;;  %v470_v35 = vld [vmem:[#allocation7 + $0x428] sm:$0xff]  ;;  %v468_v36 = vld [vmem:[#allocation7 + $0x418] sm:$0xff]  ;;  %v147_v40 = vlaneseq }
  0x89   :  { %1454 = vmatpush1.bf16.msra.mxu1 %v1453_v61  ;;  %v1477_v61 = vpack.c.bf16 %v439_v60, %v435_v59  ;;  %v453_v16 = vld [vmem:[#allocation7 + $0x3a0] sm:$0xff]  ;;  %v472_v38 = vld [vmem:[#allocation7 + $0x438] sm:$0xff]  ;;  %v471_v3 = vld [vmem:[#allocation7 + $0x430] sm:$0xff] }
  0x8a   :  { %1456 = vmatprep.subr.bf16.mxu1 %v1455_v62  ;;  %v442_v62 = vld [vmem:[#allocation7 + $0x348] sm:$0xff]  ;;  %v1357_v18 = vpack.c.bf16 %v453_v16, %v449_v15  ;;  %v457_v27 = vld [vmem:[#allocation7 + $0x3c0] sm:$0xff]  ;;  %v1491_v39 = vpack.c.bf16 %v472_v38, %v468_v36  ;;  %v1901_v43 = vld [vmem:[%s1957_s2] sm:$0xf] }
  0x8b   :  { %1330 = vmatpush1.bf16.msra.mxu0 %v1329_v52  ;;  %v436_v52 = vld [vmem:[#allocation7 + $0x318] sm:$0xff]  ;;  %v461_v28 = vld [vmem:[#allocation7 + $0x3e0] sm:$0xff]  ;;  %v474_v4 = vld [vmem:[#allocation7 + $0x448] sm:$0xff] }
  0x8c   :  { %1332 = vmatprep.subr.bf16.mxu0 %v1331_v5  ;;  %v1475_v57 = vpack.c.bf16 %v440_v54, %v436_v52  ;;  %v1479_v5 = vpack.c.bf16 %v448_v2, %v444_v0  ;;  %v1361_v30 = vpack.c.bf16 %v461_v28, %v457_v27  ;;  %v469_v0 = vld [vmem:[#allocation7 + $0x420] sm:$0xff]  ;;  %v467_v2 = vld [vmem:[#allocation7 + $0x410] sm:$0xff]  ;;  %v496_v36 = vld [vmem:[#allocation7 + $0x4f8] sm:$0xff] }
  0x8d   :  { %1458 = vmatpush1.bf16.msra.mxu1 %v1457_v1  ;;  %v1351_v1 = vpack.c.bf16 %v446_v63, %v442_v62  ;;  %v465_v63 = vld [vmem:[#allocation7 + $0x400] sm:$0xff] }
  0x8e   :  { %1460 = vmatprep.subr.bf16.mxu1 %v1459_v9  ;;  %v1481_v9 = vpack.c.bf16 %v447_v8, %v443_v7  ;;  %v476_v7 = vld [vmem:[#allocation7 + $0x458] sm:$0xff]  ;;  %v477_v15 = vld [vmem:[#allocation7 + $0x460] sm:$0xff] }
  0x8f   :  { %1334 = vmatpush1.bf16.msra.mxu0 %v1333_v10  ;;  %v450_v10 = vld [vmem:[#allocation7 + $0x388] sm:$0xff]  ;;  %v480_v8 = vld [vmem:[#allocation7 + $0x478] sm:$0xff]  ;;  %v481_v27 = vld [vmem:[#allocation7 + $0x480] sm:$0xff] }
  0x90   :  { %1336 = vmatprep.subr.bf16.mxu0 %v1335_v17  ;;  %v1483_v17 = vpack.c.bf16 %v456_v14, %v452_v12  ;;  %v1365_v12 = vpack.c.bf16 %v469_v0, %v465_v63  ;;  %v473_v14 = vld [vmem:[#allocation7 + $0x440] sm:$0xff]  ;;  %v499_v0 = vld [vmem:[#allocation7 + $0x510] sm:$0xff] }
  0x91   :  { %1462 = vmatpush1.bf16.msra.mxu1 %v1461_v13  ;;  %v1355_v13 = vpack.c.bf16 %v454_v11, %v450_v10  ;;  %v485_v28 = vld [vmem:[#allocation7 + $0x4a0] sm:$0xff] }
  0x92   :  { %1464 = vmatprep.subr.bf16.mxu1 %v1463_v21  ;;  %v1485_v21 = vpack.c.bf16 %v455_v20, %v451_v19  ;;  %v475_v19 = vld [vmem:[#allocation7 + $0x450] sm:$0xff] }
  0x93   :  { %1338 = vmatpush1.bf16.msra.mxu0 %v1337_v22  ;;  %v458_v22 = vld [vmem:[#allocation7 + $0x3c8] sm:$0xff]  ;;  %v479_v20 = vld [vmem:[#allocation7 + $0x470] sm:$0xff] }
  0x94   :  { %1340 = vmatprep.subr.bf16.mxu0 %v1339_v29  ;;  %v1487_v29 = vpack.c.bf16 %v464_v26, %v460_v24  ;;  %v488_v24 = vld [vmem:[#allocation7 + $0x4b8] sm:$0xff]  ;;  %v1497_v26 = vpack.c.bf16 %v479_v20, %v475_v19  ;;  %v513_v20 = vld [vmem:[#allocation7 + $0x580] sm:$0xff] }
  0x95   :  { %1466 = vmatpush1.bf16.msra.mxu1 %v1465_v25  ;;  %v1359_v25 = vpack.c.bf16 %v462_v23, %v458_v22  ;;  %v486_v22 = vld [vmem:[#allocation7 + $0x4a8] sm:$0xff]  ;;  %v484_v23 = vld [vmem:[#allocation7 + $0x498] sm:$0xff] }
  0x96   :  { %1468 = vmatprep.subr.bf16.mxu1 %v1467_v33  ;;  %v1489_v33 = vpack.c.bf16 %v463_v32, %v459_v31  ;;  %v483_v31 = vld [vmem:[#allocation7 + $0x490] sm:$0xff] }
  0x97   :  { %1342 = vmatpush1.bf16.msra.mxu0 %v1341_v34  ;;  %v466_v34 = vld [vmem:[#allocation7 + $0x408] sm:$0xff]  ;;  %v487_v32 = vld [vmem:[#allocation7 + $0x4b0] sm:$0xff] }
  0x98   :  { %1344 = vmatprep.subr.bf16.mxu0 %v1343_v41  ;;  %v1895_v41 = vshrl.u32 %v147_v40, 7  ;;  %v1501_v38 = vpack.c.bf16 %v487_v32, %v483_v31  ;;  %v493_v40 = vld [vmem:[#allocation7 + $0x4e0] sm:$0xff] }
  0x99   :  { %1470 = vmatpush1.bf16.msra.mxu1 %v1469_v37  ;;  %v1363_v37 = vpack.c.bf16 %v470_v35, %v466_v34  ;;  %v494_v34 = vld [vmem:[#allocation7 + $0x4e8] sm:$0xff]  ;;  %v492_v35 = vld [vmem:[#allocation7 + $0x4d8] sm:$0xff] }
  0x9a   :  { %1472 = vmatprep.subr.bf16.mxu1 %v1471_v45  ;;  %v149_v42 = vsub.s32 0, %v1895_v41  ;;  %v153_v44 = vsub.s32 1, %v1895_v41 }
  0x9b   :  { %1346 = vmatpush1.bf16.msra.mxu0 %v1345_v46 }
  0x9c   :  { %1348 = vmatprep.subr.bf16.mxu0 %v1347_v53  ;;  %v150_v45 = vrot.slane %v1901_v43, %v149_v42  ;;  %v154_v46 = vrot.slane %v1901_v43, %v153_v44  ;;  %v161_v53 = vsub.s32 3, %v1895_v41 }
  0x9d   :  { %1474 = vmatpush1.bf16.msra.mxu1 %v1473_v49 }
  0x9e   :  { %1476 = vmatprep.subr.bf16.mxu1 %v1475_v57  ;;  %v162_v54 = vrot.slane %v1901_v43, %v161_v53 }
  0x9f   :  { %1350 = vmatpush1.bf16.msra.mxu0 %v1349_v58 }
  0xa0   :  { %1352 = vmatprep.subr.bf16.mxu0 %v1351_v1 }
  0xa1   :  { %1478 = vmatpush1.bf16.msra.mxu1 %v1477_v61 }
  0xa2   :  { %1480 = vmatprep.subr.bf16.mxu1 %v1479_v5 }
  0xa3   :  { %1354 = vmatpush1.bf16.msra.mxu0 %v1353_v6  ;;  %v478_v6 = vld [vmem:[#allocation7 + $0x468] sm:$0xff] }
  0xa4   :  { %1356 = vmatprep.subr.bf16.mxu0 %v1355_v13  ;;  %v1493_v13 = vpack.c.bf16 %v471_v3, %v467_v2  ;;  %v506_v2 = vld [vmem:[#allocation7 + $0x548] sm:$0xff] }
  0xa5   :  { %1482 = vmatpush1.bf16.msra.mxu1 %v1481_v9  ;;  %v510_v3 = vld [vmem:[#allocation7 + $0x568] sm:$0xff] }
  0xa6   :  { %1484 = vmatprep.subr.bf16.mxu1 %v1483_v17  ;;  %v1367_v17 = vpack.c.bf16 %v478_v6, %v474_v4  ;;  %v508_v4 = vld [vmem:[#allocation7 + $0x558] sm:$0xff] }
  0xa7   :  { %1358 = vmatpush1.bf16.msra.mxu0 %v1357_v18  ;;  %v1495_v18 = vpack.c.bf16 %v480_v8, %v476_v7  ;;  %v505_v7 = vld [vmem:[#allocation7 + $0x540] sm:$0xff] }
  0xa8   :  { %1360 = vmatprep.subr.bf16.mxu0 %v1359_v25  ;;  %v1369_v25 = vpack.c.bf16 %v477_v15, %v473_v14  ;;  %v509_v8 = vld [vmem:[#allocation7 + $0x560] sm:$0xff]  ;;  %v518_v14 = vld [vmem:[#allocation7 + $0x5a8] sm:$0xff]  ;;  %v516_v15 = vld [vmem:[#allocation7 + $0x598] sm:$0xff] }
  0xa9   :  { %1486 = vmatpush1.bf16.msra.mxu1 %v1485_v21  ;;  %v482_v21 = vld [vmem:[#allocation7 + $0x488] sm:$0xff] }
  0xaa   :  { %1488 = vmatprep.subr.bf16.mxu1 %v1487_v29  ;;  %v1371_v29 = vpack.c.bf16 %v486_v22, %v482_v21  ;;  %v517_v21 = vld [vmem:[#allocation7 + $0x5a0] sm:$0xff] }
  0xab   :  { %1362 = vmatpush1.bf16.msra.mxu0 %v1361_v30  ;;  %v1499_v30 = vpack.c.bf16 %v488_v24, %v484_v23  ;;  %v515_v24 = vld [vmem:[#allocation7 + $0x590] sm:$0xff]  ;;  %v1389_v31 = vpack.c.bf16 %v517_v21, %v513_v20  ;;  %v556_v20 = vld [vmem:[#allocation7 + $0x6d8] sm:$0xff] }
  0xac   :  { %1364 = vmatprep.subr.bf16.mxu0 %v1363_v37  ;;  %v1373_v37 = vpack.c.bf16 %v485_v28, %v481_v27  ;;  %v526_v27 = vld [vmem:[#allocation7 + $0x5e8] sm:$0xff]  ;;  %v524_v28 = vld [vmem:[#allocation7 + $0x5d8] sm:$0xff] }
  0xad   :  { %1490 = vmatpush1.bf16.msra.mxu1 %v1489_v33  ;;  %v490_v33 = vld [vmem:[#allocation7 + $0x4c8] sm:$0xff]  ;;  %v560_v21 = vld [vmem:[#allocation7 + $0x6f8] sm:$0xff] }
  0xae   :  { %1492 = vmatprep.subr.bf16.mxu1 %v1491_v39  ;;  %v489_v39 = vld [vmem:[#allocation7 + $0x4c0] sm:$0xff] }
 0x141   :  { %v233_v47 = vpop.f32.mrb[0].mxu0 }
 0x142   :  { %v234_v48 = vadd.f32 %v233_v47, %v150_v45  ;;  %v235_v49 = vpop.f32.mrb[1].mxu0  ;;  %v1375_v45 = vpack.c.bf16 %v494_v34, %v490_v33  ;;  %v491_v47 = vld [vmem:[#allocation7 + $0x4d0] sm:$0xff]  ;;  %v521_v33 = vld [vmem:[#allocation7 + $0x5c0] sm:$0xff] }
 0x143   :  { %v236_v50 = vadd.f32 %v235_v49, %v154_v46  ;;  %v1914_v55 = vpop.f32.mrb[0].mxu1  ;;  %v1503_v46 = vpack.c.bf16 %v496_v36, %v492_v35  ;;  %v498_v49 = vld [vmem:[#allocation7 + $0x508] sm:$0xff]  ;;  %v525_v34 = vld [vmem:[#allocation7 + $0x5e0] sm:$0xff] }
 0x144   :  { %v1156_v51 = vmul.f32 -1.442695, %v234_v48  ;;  %v306_v56 = vpop.f32.mrb[1].mxu1 }
 0x145   :  { %v1157_v52 = vmul.f32 -1.442695, %v236_v50  ;;  %v1916_v57 = vadd.f32 %v306_v56, %v162_v54  ;;  %v504_v54 = vld [vmem:[#allocation7 + $0x538] sm:$0xff] }
 0x146   :  { %1637 = vpow2.f32 %v1156_v51  ;;  %v502_v51 = vld [vmem:[#allocation7 + $0x528] sm:$0xff] }
 0x147   :  { %1639 = vpow2.f32 %v1157_v52  ;;  %v1159_v59 = vmul.f32 -1.442695, %v1916_v57  ;;  %v500_v52 = vld [vmem:[#allocation7 + $0x518] sm:$0xff] }
 0x148   :  { %v1507_v63 = vpack.c.bf16 %v504_v54, %v500_v52  ;;  %v531_v54 = vld [vmem:[#allocation7 + $0x610] sm:$0xff] }
 0x149   :  { %1641 = vpow2.f32 %v1159_v59 }
 0x150   :  { %v1638_v58 = vpop.eup %1637 }
 0x151   :  { %v1640_v60 = vpop.eup %1639  ;;  %v321_v61 = vadd.f32 1.0, %v1638_v58  ;;  %v1377_v58 = vpack.c.bf16 %v493_v40, %v489_v39  ;;  %v530_v39 = vld [vmem:[#allocation7 + $0x608] sm:$0xff] }
 0x152   :  { %v322_v62 = vadd.f32 1.0, %v1640_v60  ;;  %v497_v60 = vld [vmem:[#allocation7 + $0x500] sm:$0xff]  ;;  %v534_v40 = vld [vmem:[#allocation7 + $0x628] sm:$0xff] }
 0x153   :  { %1643 = vrcp.f32 %v321_v61  ;;  %v1642_v1 = vpop.eup %1641  ;;  %v501_v61 = vld [vmem:[#allocation7 + $0x520] sm:$0xff] }
 0x154   :  { %1645 = vrcp.f32 %v322_v62  ;;  %v324_v9 = vadd.f32 1.0, %v1642_v1  ;;  %v1379_v62 = vpack.c.bf16 %v502_v51, %v498_v49  ;;  %v503_v1 = vld [vmem:[#allocation7 + $0x530] sm:$0xff]  ;;  %v529_v49 = vld [vmem:[#allocation7 + $0x600] sm:$0xff]  ;;  %v1395_v51 = vpack.c.bf16 %v534_v40, %v530_v39 }
 0x155   :  { %v1509_v6 = vpack.c.bf16 %v503_v1, %v499_v0  ;;  %v537_v0 = vld [vmem:[#allocation7 + $0x640] sm:$0xff] }
 0x156   :  { %1647 = vrcp.f32 %v324_v9  ;;  %v1383_v9 = vpack.c.bf16 %v510_v3, %v506_v2  ;;  %v541_v1 = vld [vmem:[#allocation7 + $0x660] sm:$0xff] }
 0x15d   :  { %v1644_v5 = vpop.eup %1643 }
 0x15e   :  { %v1646_v10 = vpop.eup %1645  ;;  %v333_v16 = vmul.f32 %v1644_v5, %v234_v48  ;;  %v495_v48 = vld [vmem:[#allocation7 + $0x4f0] sm:$0xff]  ;;  %v512_v5 = vld [vmem:[#allocation7 + $0x578] sm:$0xff] }
 0x15f   :  { %v334_v11 = vmul.f32 %v1646_v10, %v236_v50  ;;  %v1505_v59 = vpack.c.bf16 %v495_v48, %v491_v47  ;;  %v1511_v10 = vpack.c.bf16 %v512_v5, %v508_v4  ;;  %v539_v4 = vld [vmem:[#allocation7 + $0x650] sm:$0xff] }
 0x160   :  { %v1648_v50 = vpop.eup %1647  ;;  %v543_v5 = vld [vmem:[#allocation7 + $0x670] sm:$0xff] }
 0x161   :  { %679 = vmatprep.mubr.f32.mxu0 %v334_v11  ;;  %821 = vmatprep.mubr.f32.mxu1 %v334_v11  ;;  %v336_v56 = vmul.f32 %v1648_v50, %v1916_v57  ;;  %v1381_v57 = vpack.c.bf16 %v501_v61, %v497_v60  ;;  %v507_v11 = vld [vmem:[#allocation7 + $0x550] sm:$0xff]  ;;  %v533_v50 = vld [vmem:[#allocation7 + $0x620] sm:$0xff]  ;;  %v540_v60 = vld [vmem:[#allocation7 + $0x658] sm:$0xff] }
 0x162   :  { %680 = vmatmul.mubr.f32.vlgmr.msra.gmra.mrb[2].mxu0 %v333_v16  ;;  %822 = vmatmul.mubr.f32.vlgmr.msra.gmra.mrb[2].mxu1 %v333_v16  ;;  %v520_v16 = vld [vmem:[#allocation7 + $0x5b8] sm:$0xff] }
 0x163   :  { %1366 = vmatpush1.bf16.msra.mxu0 %v1365_v12  ;;  %1494 = vmatpush1.bf16.msra.mxu1 %v1493_v13  ;;  %v511_v12 = vld [vmem:[#allocation7 + $0x570] sm:$0xff]  ;;  %v514_v13 = vld [vmem:[#allocation7 + $0x588] sm:$0xff]  ;;  %v1515_v23 = vpack.c.bf16 %v520_v16, %v516_v15  ;;  %v544_v61 = vld [vmem:[#allocation7 + $0x678] sm:$0xff] }
 0x164   :  { %1368 = vmatprep.subr.bf16.mxu0 %v1367_v17  ;;  %1496 = vmatprep.subr.bf16.mxu1 %v1495_v18  ;;  %v157_v17 = vsub.s32 2, %v1895_v41  ;;  %v1385_v18 = vpack.c.bf16 %v509_v8, %v505_v7  ;;  %v1513_v19 = vpack.c.bf16 %v511_v12, %v507_v11  ;;  %v1387_v22 = vpack.c.bf16 %v518_v14, %v514_v13  ;;  %v548_v7 = vld [vmem:[#allocation7 + $0x698] sm:$0xff]  ;;  %v545_v11 = vld [vmem:[#allocation7 + $0x680] sm:$0xff]  ;;  %v547_v15 = vld [vmem:[#allocation7 + $0x690] sm:$0xff] }
 0x165   :  { %750 = vmatprep.mubr.f32.mxu0 %v336_v56  ;;  %892 = vmatprep.mubr.f32.mxu1 %v336_v56  ;;  %v535_v56 = vld [vmem:[#allocation7 + $0x630] sm:$0xff]  ;;  %v1527_v3 = vpack.c.bf16 %v544_v61, %v540_v60  ;;  %v552_v8 = vld [vmem:[#allocation7 + $0x6b8] sm:$0xff]  ;;  %v549_v12 = vld [vmem:[#allocation7 + $0x6a0] sm:$0xff] }
 0x166   :  { %v1531_v14 = vpack.c.bf16 %v552_v8, %v548_v7  ;;  %v551_v16 = vld [vmem:[#allocation7 + $0x6b0] sm:$0xff] }
 0x167   :  { %1370 = vmatpush1.bf16.msra.mxu0 %v1369_v25  ;;  %1498 = vmatpush1.bf16.msra.mxu1 %v1497_v26  ;;  %v519_v25 = vld [vmem:[#allocation7 + $0x5b0] sm:$0xff]  ;;  %v522_v26 = vld [vmem:[#allocation7 + $0x5c8] sm:$0xff] }
 0x168   :  { %1372 = vmatprep.subr.bf16.mxu0 %v1371_v29  ;;  %1500 = vmatprep.subr.bf16.mxu1 %v1499_v30  ;;  %v528_v29 = vld [vmem:[#allocation7 + $0x5f8] sm:$0xff]  ;;  %v158_v30 = vrot.slane %v1901_v43, %v157_v17  ;;  %v1517_v32 = vpack.c.bf16 %v519_v25, %v515_v24  ;;  %v1391_v35 = vpack.c.bf16 %v526_v27, %v522_v26  ;;  %v553_v24 = vld [vmem:[#allocation7 + $0x6c0] sm:$0xff]  ;;  %v571_v61 = vld [vmem:[#allocation7 + $0x750] sm:$0xff] }
 0x169   :  { %v1519_v36 = vpack.c.bf16 %v528_v29, %v524_v28  ;;  %v1393_v43 = vpack.c.bf16 %v525_v34, %v521_v33  ;;  %v557_v25 = vld [vmem:[#allocation7 + $0x6e0] sm:$0xff]  ;;  %v1535_v27 = vpack.c.bf16 %v560_v21, %v556_v20  ;;  %v555_v28 = vld [vmem:[#allocation7 + $0x6d0] sm:$0xff]  ;;  %v568_v33 = vld [vmem:[#allocation7 + $0x738] sm:$0xff] }
 0x16a   :  { %v1925_v47 = vadd.f32 %v1914_v55, %v158_v30  ;;  %v1397_v55 = vpack.c.bf16 %v533_v50, %v529_v49  ;;  %v559_v29 = vld [vmem:[#allocation7 + $0x6f0] sm:$0xff]  ;;  %v562_v30 = vld [vmem:[#allocation7 + $0x708] sm:$0xff]  ;;  %v1409_v34 = vpack.c.bf16 %v557_v25, %v553_v24  ;;  %v572_v49 = vld [vmem:[#allocation7 + $0x758] sm:$0xff] }
 0x16b   :  { %1374 = vmatpush1.bf16.msra.mxu0 %v1373_v37  ;;  %1502 = vmatpush1.bf16.msra.mxu1 %v1501_v38  ;;  %v523_v37 = vld [vmem:[#allocation7 + $0x5d0] sm:$0xff]  ;;  %v576_v50 = vld [vmem:[#allocation7 + $0x778] sm:$0xff] }
 0x16c   :  { %1376 = vmatprep.subr.bf16.mxu0 %v1375_v45  ;;  %1504 = vmatprep.subr.bf16.mxu1 %v1503_v46  ;;  %v527_v38 = vld [vmem:[#allocation7 + $0x5f0] sm:$0xff]  ;;  %v532_v45 = vld [vmem:[#allocation7 + $0x618] sm:$0xff]  ;;  %v1543_v60 = vpack.c.bf16 %v576_v50, %v572_v49 }
 0x16d   :  { %v536_v46 = vld [vmem:[#allocation7 + $0x638] sm:$0xff]  ;;  %v1521_v48 = vpack.c.bf16 %v527_v38, %v523_v37  ;;  %v565_v37 = vld [vmem:[#allocation7 + $0x720] sm:$0xff]  ;;  %v579_v7 = vld [vmem:[#allocation7 + $0x790] sm:$0xff] }
 0x16e   :  { %v1523_v52 = vpack.c.bf16 %v536_v46, %v532_v45  ;;  %v563_v45 = vld [vmem:[#allocation7 + $0x710] sm:$0xff] }
 0x16f   :  { %1378 = vmatpush1.bf16.msra.mxu0 %v1377_v58  ;;  %1506 = vmatpush1.bf16.msra.mxu1 %v1505_v59  ;;  %v538_v58 = vld [vmem:[#allocation7 + $0x648] sm:$0xff]  ;;  %v567_v46 = vld [vmem:[#allocation7 + $0x730] sm:$0xff] }
 0x170   :  { %1380 = vmatprep.subr.bf16.mxu0 %v1379_v62  ;;  %1508 = vmatprep.subr.bf16.mxu1 %v1507_v63  ;;  %v542_v59 = vld [vmem:[#allocation7 + $0x668] sm:$0xff]  ;;  %v1158_v62 = vmul.f32 -1.442695, %v1925_v47  ;;  %v1525_v63 = vpack.c.bf16 %v535_v56, %v531_v54  ;;  %v1541_v54 = vpack.c.bf16 %v567_v46, %v563_v45  ;;  %v569_v56 = vld [vmem:[#allocation7 + $0x740] sm:$0xff]  ;;  %v583_v8 = vld [vmem:[#allocation7 + $0x7b0] sm:$0xff] }
 0x171   :  { %v1399_v2 = vpack.c.bf16 %v542_v59, %v538_v58  ;;  %v573_v58 = vld [vmem:[#allocation7 + $0x760] sm:$0xff]  ;;  %v587_v20 = vld [vmem:[#allocation7 + $0x7d0] sm:$0xff]  ;;  %v978_v45 = vld [vmem:[#allocation8 + $0x198] sm:$0xff] }
 0x172   :  { %1649 = vpow2.f32 %v1158_v62  ;;  %v575_v62 = vld [vmem:[#allocation7 + $0x770] sm:$0xff] }
 0x173   :  { %1382 = vmatpush1.bf16.msra.mxu0 %v1381_v57  ;;  %1510 = vmatpush1.bf16.msra.mxu1 %v1509_v6  ;;  %v546_v57 = vld [vmem:[#allocation7 + $0x688] sm:$0xff]  ;;  %v591_v21 = vld [vmem:[#allocation7 + $0x7f0] sm:$0xff] }
 0x174   :  { %1384 = vmatprep.subr.bf16.mxu0 %v1383_v9  ;;  %1512 = vmatprep.subr.bf16.mxu1 %v1511_v10  ;;  %v550_v6 = vld [vmem:[#allocation7 + $0x6a8] sm:$0xff]  ;;  %v1401_v9 = vpack.c.bf16 %v541_v1, %v537_v0  ;;  %v1529_v10 = vpack.c.bf16 %v543_v5, %v539_v4  ;;  %v580_v0 = vld [vmem:[#allocation7 + $0x798] sm:$0xff]  ;;  %v577_v4 = vld [vmem:[#allocation7 + $0x780] sm:$0xff] }
 0x175   :  { %v1403_v13 = vpack.c.bf16 %v550_v6, %v546_v57  ;;  %v584_v1 = vld [vmem:[#allocation7 + $0x7b8] sm:$0xff]  ;;  %v581_v5 = vld [vmem:[#allocation7 + $0x7a0] sm:$0xff]  ;;  %v929_v46 = vld [vmem:[#allocation8 + $0x10] sm:$0xff] }
 0x176   :  { %v1547_v6 = vpack.c.bf16 %v584_v1, %v580_v0  ;;  %v961_v50 = vld [vmem:[#allocation8 + $0x110] sm:$0xff]  ;;  %v963_v0 = vld [vmem:[#allocation8 + $0x120] sm:$0xff]  ;;  %v964_v1 = vld [vmem:[#allocation8 + $0x128] sm:$0xff] }
 0x177   :  { %1386 = vmatpush1.bf16.msra.mxu0 %v1385_v18  ;;  %1514 = vmatpush1.bf16.msra.mxu1 %v1513_v19  ;;  %v554_v18 = vld [vmem:[#allocation7 + $0x6c8] sm:$0xff] }
 0x178   :  { %1388 = vmatprep.subr.bf16.mxu0 %v1387_v22  ;;  %1516 = vmatprep.subr.bf16.mxu1 %v1515_v23  ;;  %v558_v19 = vld [vmem:[#allocation7 + $0x6e8] sm:$0xff]  ;;  %v1405_v22 = vpack.c.bf16 %v549_v12, %v545_v11  ;;  %v1533_v23 = vpack.c.bf16 %v551_v16, %v547_v15  ;;  %v588_v11 = vld [vmem:[#allocation7 + $0x7d8] sm:$0xff]  ;;  %v585_v15 = vld [vmem:[#allocation7 + $0x7c0] sm:$0xff] }
 0x179   :  { %v1407_v26 = vpack.c.bf16 %v558_v19, %v554_v18  ;;  %v592_v12 = vld [vmem:[#allocation7 + $0x7f8] sm:$0xff]  ;;  %v589_v19 = vld [vmem:[#allocation7 + $0x7e0] sm:$0xff] }
 0x17a   :  { %v1551_v18 = vpack.c.bf16 %v592_v12, %v588_v11  ;;  %v965_v11 = vld [vmem:[#allocation8 + $0x130] sm:$0xff]  ;;  %v966_v12 = vld [vmem:[#allocation8 + $0x138] sm:$0xff] }
 0x17b   :  { %1390 = vmatpush1.bf16.msra.mxu0 %v1389_v31  ;;  %1518 = vmatpush1.bf16.msra.mxu1 %v1517_v32  ;;  %v566_v31 = vld [vmem:[#allocation7 + $0x728] sm:$0xff]  ;;  %v564_v32 = vld [vmem:[#allocation7 + $0x718] sm:$0xff] }
 0x17c   :  { %1392 = vmatprep.subr.bf16.mxu0 %v1391_v35  ;;  %1520 = vmatprep.subr.bf16.mxu1 %v1519_v36  ;;  %v1537_v35 = vpack.c.bf16 %v559_v29, %v555_v28  ;;  %v561_v36 = vld [vmem:[#allocation7 + $0x700] sm:$0xff]  ;;  %v1650_v38 = vpop.eup %1649  ;;  %v1411_v39 = vpack.c.bf16 %v566_v31, %v562_v30  ;;  %v1539_v40 = vpack.c.bf16 %v568_v33, %v564_v32  ;;  %v976_v30 = vld [vmem:[#allocation8 + $0x188] sm:$0xff] }
 0x17d   :  { %v975_v28 = vld [vmem:[#allocation8 + $0x180] sm:$0xff]  ;;  %v928_v32 = vld [vmem:[#allocation8 + $0x8] sm:$0xff] }
 0x17e   :  { %v927_v31 = vld [vmem:[#allocation8] sm:$0xff]  ;;  %v1587_v33 = vpack.c.bf16 %v976_v30, %v975_v28  ;;  %v954_v28 = vld [vmem:[#allocation8 + $0xd8] sm:$0xff] }
 0x17f   :  { %1394 = vmatpush1.bf16.msra.mxu0 %v1393_v43  ;;  %1522 = vmatpush1.bf16.msra.mxu1 %v1521_v48  ;;  %v570_v43 = vld [vmem:[#allocation7 + $0x748] sm:$0xff] }
 0x180   :  { %1396 = vmatprep.subr.bf16.mxu0 %v1395_v51  ;;  %1524 = vmatprep.subr.bf16.mxu1 %v1523_v52  ;;  %v574_v48 = vld [vmem:[#allocation7 + $0x768] sm:$0xff]  ;;  %v323_v51 = vadd.f32 1.0, %v1650_v38  ;;  %v1413_v52 = vpack.c.bf16 %v565_v37, %v561_v36  ;;  %v945_v38 = vld [vmem:[#allocation8 + $0x90] sm:$0xff] }
 0x181   :  { %v1415_v59 = vpack.c.bf16 %v574_v48, %v570_v43  ;;  %v960_v36 = vld [vmem:[#allocation8 + $0x108] sm:$0xff]  ;;  %v930_v43 = vld [vmem:[#allocation8 + $0x18] sm:$0xff] }
 0x182   :  { %1651 = vrcp.f32 %v323_v51  ;;  %v1561_v49 = vpack.c.bf16 %v930_v43, %v929_v46  ;;  %v962_v51 = vld [vmem:[#allocation8 + $0x118] sm:$0xff]  ;;  %v988_v46 = vld [vmem:[#allocation8 + $0x1e8] sm:$0xff]  ;;  %v939_v43 = vld [vmem:[#allocation8 + $0x60] sm:$0xff] }
 0x183   :  { %1398 = vmatpush1.bf16.msra.mxu0 %v1397_v55  ;;  %1526 = vmatpush1.bf16.msra.mxu1 %v1525_v63  ;;  %v578_v55 = vld [vmem:[#allocation7 + $0x788] sm:$0xff] }
 0x184   :  { %1400 = vmatprep.subr.bf16.mxu0 %v1399_v2  ;;  %1528 = vmatprep.subr.bf16.mxu1 %v1527_v3  ;;  %v582_v63 = vld [vmem:[#allocation7 + $0x7a8] sm:$0xff]  ;;  %v1417_v2 = vpack.c.bf16 %v573_v58, %v569_v56  ;;  %v1545_v3 = vpack.c.bf16 %v575_v62, %v571_v61  ;;  %v979_v58 = vld [vmem:[#allocation8 + $0x1a0] sm:$0xff] }
 0x185   :  { %v1419_v57 = vpack.c.bf16 %v582_v63, %v578_v55  ;;  %v948_v56 = vld [vmem:[#allocation8 + $0xa8] sm:$0xff]  ;;  %v931_v61 = vld [vmem:[#allocation8 + $0x20] sm:$0xff] }
 0x186   :  { %v932_v62 = vld [vmem:[#allocation8 + $0x28] sm:$0xff] }
 0x187   :  { %1402 = vmatpush1.bf16.msra.mxu0 %v1401_v9  ;;  %1530 = vmatpush1.bf16.msra.mxu1 %v1529_v10  ;;  %v586_v9 = vld [vmem:[#allocation7 + $0x7c8] sm:$0xff]  ;;  %v1565_v63 = vpack.c.bf16 %v932_v62, %v931_v61  ;;  %v990_v61 = vld [vmem:[#allocation8 + $0x1f8] sm:$0xff]  ;;  %v941_v62 = vld [vmem:[#allocation8 + $0x70] sm:$0xff] }
 0x188   :  { %1404 = vmatprep.subr.bf16.mxu0 %v1403_v13  ;;  %1532 = vmatprep.subr.bf16.mxu1 %v1531_v14  ;;  %v590_v10 = vld [vmem:[#allocation7 + $0x7e8] sm:$0xff]  ;;  %v1421_v13 = vpack.c.bf16 %v581_v5, %v577_v4  ;;  %v1549_v14 = vpack.c.bf16 %v583_v8, %v579_v7  ;;  %v950_v4 = vld [vmem:[#allocation8 + $0xb8] sm:$0xff]  ;;  %v981_v5 = vld [vmem:[#allocation8 + $0x1b0] sm:$0xff] }
 0x189   :  { %v1423_v16 = vpack.c.bf16 %v590_v10, %v586_v9  ;;  %v933_v7 = vld [vmem:[#allocation8 + $0x30] sm:$0xff]  ;;  %v934_v8 = vld [vmem:[#allocation8 + $0x38] sm:$0xff] }
 0x18a   :  { %v1569_v10 = vpack.c.bf16 %v934_v8, %v933_v7 }
 0x18b   :  { %1406 = vmatpush1.bf16.msra.mxu0 %v1405_v22  ;;  %1534 = vmatpush1.bf16.msra.mxu1 %v1533_v23  ;;  %v1425_v22 = vpack.c.bf16 %v589_v19, %v585_v15  ;;  %v1553_v23 = vpack.c.bf16 %v591_v21, %v587_v20  ;;  %v952_v15 = vld [vmem:[#allocation8 + $0xc8] sm:$0xff]  ;;  %v935_v20 = vld [vmem:[#allocation8 + $0x40] sm:$0xff] }
 0x18c   :  { %1408 = vmatprep.subr.bf16.mxu0 %v1407_v26  ;;  %1536 = vmatprep.subr.bf16.mxu1 %v1535_v27  ;;  %v1652_v24 = vpop.eup %1651  ;;  %v943_v26 = vld [vmem:[#allocation8 + $0x80] sm:$0xff]  ;;  %v944_v27 = vld [vmem:[#allocation8 + $0x88] sm:$0xff] }
 0x18d   :  { %v335_v25 = vmul.f32 %v1652_v24, %v1925_v47  ;;  %v1555_v29 = vpack.c.bf16 %v944_v27, %v943_v26  ;;  %v977_v47 = vld [vmem:[#allocation8 + $0x190] sm:$0xff]  ;;  %v984_v19 = vld [vmem:[#allocation8 + $0x1c8] sm:$0xff]  ;;  %v967_v24 = vld [vmem:[#allocation8 + $0x140] sm:$0xff] }
 0x18e   :  { %v1591_v48 = vpack.c.bf16 %v978_v45, %v977_v47  ;;  %v936_v21 = vld [vmem:[#allocation8 + $0x48] sm:$0xff]  ;;  %v953_v27 = vld [vmem:[#allocation8 + $0xd0] sm:$0xff] }
 0x18f   :  { %1410 = vmatpush1.bf16.msra.mxu0 %v1409_v34  ;;  %1538 = vmatpush1.bf16.msra.mxu1 %v1537_v35  ;;  %v1557_v34 = vpack.c.bf16 %v928_v32, %v927_v31  ;;  %v959_v35 = vld [vmem:[#allocation8 + $0x100] sm:$0xff]  ;;  %v1575_v30 = vpack.c.bf16 %v954_v28, %v953_v27  ;;  %v986_v31 = vld [vmem:[#allocation8 + $0x1d8] sm:$0xff]  ;;  %v937_v32 = vld [vmem:[#allocation8 + $0x50] sm:$0xff] }
 0x190   :  { %1412 = vmatprep.subr.bf16.mxu0 %v1411_v39  ;;  %1540 = vmatprep.subr.bf16.mxu1 %v1539_v40  ;;  %v1589_v37 = vpack.c.bf16 %v960_v36, %v959_v35  ;;  %v946_v39 = vld [vmem:[#allocation8 + $0x98] sm:$0xff]  ;;  %v969_v36 = vld [vmem:[#allocation8 + $0x150] sm:$0xff]  ;;  %v956_v47 = vld [vmem:[#allocation8 + $0xe8] sm:$0xff] }
 0x191   :  { %v1559_v40 = vpack.c.bf16 %v946_v39, %v945_v38  ;;  %v955_v39 = vld [vmem:[#allocation8 + $0xe0] sm:$0xff] }
 0x192   :  { %v1579_v45 = vpack.c.bf16 %v956_v47, %v955_v39 }
 0x193   :  { %1414 = vmatpush1.bf16.msra.mxu0 %v1413_v52  ;;  %1542 = vmatpush1.bf16.msra.mxu1 %v1541_v54  ;;  %v1593_v52 = vpack.c.bf16 %v962_v51, %v961_v50  ;;  %v947_v54 = vld [vmem:[#allocation8 + $0xa0] sm:$0xff] }
 0x194   :  { %1416 = vmatprep.subr.bf16.mxu0 %v1415_v59  ;;  %1544 = vmatprep.subr.bf16.mxu1 %v1543_v60  ;;  %v1563_v59 = vpack.c.bf16 %v948_v56, %v947_v54  ;;  %v980_v60 = vld [vmem:[#allocation8 + $0x1a8] sm:$0xff]  ;;  %v971_v51 = vld [vmem:[#allocation8 + $0x160] sm:$0xff]  ;;  %v957_v56 = vld [vmem:[#allocation8 + $0xf0] sm:$0xff] }
 0x195   :  { %v1595_v55 = vpack.c.bf16 %v980_v60, %v979_v58  ;;  %v958_v58 = vld [vmem:[#allocation8 + $0xf8] sm:$0xff] }
 0x196   :  { %v1583_v60 = vpack.c.bf16 %v958_v58, %v957_v56 }
 0x197   :  { %1418 = vmatpush1.bf16.msra.mxu0 %v1417_v2  ;;  %1546 = vmatpush1.bf16.msra.mxu1 %v1545_v3  ;;  %v1597_v2 = vpack.c.bf16 %v964_v1, %v963_v0  ;;  %v949_v3 = vld [vmem:[#allocation8 + $0xb0] sm:$0xff] }
 0x198   :  { %1420 = vmatprep.subr.bf16.mxu0 %v1419_v57  ;;  %1548 = vmatprep.subr.bf16.mxu1 %v1547_v6  ;;  %v1567_v57 = vpack.c.bf16 %v950_v4, %v949_v3  ;;  %v982_v6 = vld [vmem:[#allocation8 + $0x1b8] sm:$0xff]  ;;  %v973_v1 = vld [vmem:[#allocation8 + $0x170] sm:$0xff] }
 0x199   :  { %v1599_v9 = vpack.c.bf16 %v982_v6, %v981_v5  ;;  %v593_v4 = vld [vmem:[%s1959_s4] sm:$0xf] }
 0x19a   :  { %v598_v5 = vrot.slane %v593_v4, %v149_v42  ;;  %v602_v6 = vrot.slane %v593_v4, %v153_v44  ;;  %v610_v7 = vrot.slane %v593_v4, %v161_v53 }
 0x19b   :  { %1422 = vmatpush1.bf16.msra.mxu0 %v1421_v13  ;;  %1550 = vmatpush1.bf16.msra.mxu1 %v1549_v14  ;;  %v1601_v13 = vpack.c.bf16 %v966_v12, %v965_v11  ;;  %v951_v14 = vld [vmem:[#allocation8 + $0xc0] sm:$0xff] }
 0x19c   :  { %1424 = vmatprep.subr.bf16.mxu0 %v1423_v16  ;;  %1552 = vmatprep.subr.bf16.mxu1 %v1551_v18  ;;  %v983_v16 = vld [vmem:[#allocation8 + $0x1c0] sm:$0xff]  ;;  %v1571_v18 = vpack.c.bf16 %v952_v15, %v951_v14 }
 0x19f   :  { %1426 = vmatpush1.bf16.msra.mxu0 %v1425_v22  ;;  %1554 = vmatpush1.bf16.msra.mxu1 %v1553_v23  ;;  %v1603_v22 = vpack.c.bf16 %v984_v19, %v983_v16  ;;  %v1573_v23 = vpack.c.bf16 %v936_v21, %v935_v20 }
 0x1a0   :  { %1556 = vmatprep.subr.bf16.mxu0 %v1555_v29  ;;  %1588 = vmatprep.subr.bf16.mxu1 %v1587_v33  ;;  %v985_v29 = vld [vmem:[#allocation8 + $0x1d0] sm:$0xff]  ;;  %v938_v33 = vld [vmem:[#allocation8 + $0x58] sm:$0xff] }
 0x1a1   :  { %v1577_v35 = vpack.c.bf16 %v938_v33, %v937_v32 }
 0x1a2   :  { %751 = vmatmul.mubr.f32.vlgmr.msra.gmra.mrb[2].mxu0 %v335_v25  ;;  %893 = vmatmul.mubr.f32.vlgmr.msra.gmra.mrb[2].mxu1 %v335_v25  ;;  %v968_v25 = vld [vmem:[#allocation8 + $0x148] sm:$0xff] }
 0x1a3   :  { %1558 = vmatpush3.bf16.msra.mxu0 %v1557_v34  ;;  %1590 = vmatpush3.bf16.msra.mxu1 %v1589_v37  ;;  %v1605_v26 = vpack.c.bf16 %v968_v25, %v967_v24  ;;  %v1607_v34 = vpack.c.bf16 %v986_v31, %v985_v29  ;;  %v970_v37 = vld [vmem:[#allocation8 + $0x158] sm:$0xff] }
 0x1a4   :  { %1560 = vmatprep.subr.bf16.mxu0 %v1559_v40  ;;  %1592 = vmatprep.subr.bf16.mxu1 %v1591_v48  ;;  %v1609_v38 = vpack.c.bf16 %v970_v37, %v969_v36  ;;  %v987_v40 = vld [vmem:[#allocation8 + $0x1e0] sm:$0xff]  ;;  %v940_v48 = vld [vmem:[#allocation8 + $0x68] sm:$0xff] }
 0x1a5   :  { %v1581_v50 = vpack.c.bf16 %v940_v48, %v939_v43 }
 0x1a7   :  { %1562 = vmatpush3.bf16.msra.mxu0 %v1561_v49  ;;  %1594 = vmatpush3.bf16.msra.mxu1 %v1593_v52  ;;  %v1611_v49 = vpack.c.bf16 %v988_v46, %v987_v40  ;;  %v972_v52 = vld [vmem:[#allocation8 + $0x168] sm:$0xff] }
 0x1a8   :  { %1564 = vmatprep.subr.bf16.mxu0 %v1563_v59  ;;  %1596 = vmatprep.subr.bf16.mxu1 %v1595_v55  ;;  %v1613_v54 = vpack.c.bf16 %v972_v52, %v971_v51  ;;  %v989_v59 = vld [vmem:[#allocation8 + $0x1f0] sm:$0xff]  ;;  %v942_v55 = vld [vmem:[#allocation8 + $0x78] sm:$0xff] }
 0x1a9   :  { %v1585_v0 = vpack.c.bf16 %v942_v55, %v941_v62 }
 0x1ab   :  { %1566 = vmatpush3.bf16.msra.mxu0 %v1565_v63  ;;  %1598 = vmatpush3.bf16.msra.mxu1 %v1597_v2  ;;  %v1615_v63 = vpack.c.bf16 %v990_v61, %v989_v59  ;;  %v974_v2 = vld [vmem:[#allocation8 + $0x178] sm:$0xff] }
 0x1ac   :  { %1568 = vmatprep.subr.bf16.mxu0 %v1567_v57  ;;  %1600 = vmatprep.subr.bf16.mxu1 %v1599_v9  ;;  %v1617_v3 = vpack.c.bf16 %v974_v2, %v973_v1  ;;  %v606_v57 = vrot.slane %v593_v4, %v157_v17 }
 0x1af   :  { %1570 = vmatpush3.bf16.msra.mxu0 %v1569_v10  ;;  %1602 = vmatpush3.bf16.msra.mxu1 %v1601_v13 }
 0x1b0   :  { %1572 = vmatprep.subr.bf16.mxu0 %v1571_v18  ;;  %1604 = vmatprep.subr.bf16.mxu1 %v1603_v22 }
 0x1b3   :  { %1574 = vmatpush3.bf16.msra.mxu0 %v1573_v23  ;;  %1606 = vmatpush3.bf16.msra.mxu1 %v1605_v26 }
 0x1b4   :  { %1576 = vmatprep.subr.bf16.mxu0 %v1575_v30  ;;  %1608 = vmatprep.subr.bf16.mxu1 %v1607_v34  ;;  %v1164_v34 = vld [vmem:[%s1961_s6] ss:$0 sm:$0xff] }
 0x1b7   :  { %1578 = vmatpush3.bf16.msra.mxu0 %v1577_v35  ;;  %1610 = vmatpush3.bf16.msra.mxu1 %v1609_v38 }
 0x1b8   :  { %1580 = vmatprep.subr.bf16.mxu0 %v1579_v45  ;;  %1612 = vmatprep.subr.bf16.mxu1 %v1611_v49 }
 0x1bb   :  { %1582 = vmatpush3.bf16.msra.mxu0 %v1581_v50  ;;  %1614 = vmatpush3.bf16.msra.mxu1 %v1613_v54 }
 0x1bc   :  { %1584 = vmatprep.subr.bf16.mxu0 %v1583_v60  ;;  %1616 = vmatprep.subr.bf16.mxu1 %v1615_v63 }
 0x1bf   :  { %1586 = vmatpush3.bf16.msra.mxu0 %v1585_v0  ;;  %1618 = vmatpush3.bf16.msra.mxu1 %v1617_v3 }
 0x275   :  { %v752_v8 = vpop.f32.mrb[2].mxu0  ;;  %v894_v9 = vpop.f32.mrb[2].mxu1 }
 0x276   :  { %v1619_v10 = vadd.f32 %v752_v8, %v598_v5  ;;  %v1621_v11 = vadd.f32 %v894_v9, %v606_v57  ;;  %v754_v12 = vpop.f32.mrb[3].mxu0  ;;  %v896_v13 = vpop.f32.mrb[3].mxu1 }
 0x277   :  { %v1620_v14 = vadd.f32 %v754_v12, %v602_v6  ;;  %v1622_v15 = vadd.f32 %v896_v13, %v610_v7 }
 0x278   :  { %v1160_v16 = vmul.f32 -1.442695, %v1619_v10  ;;  %v1162_v18 = vmul.f32 -1.442695, %v1621_v11 }
 0x279   :  { %v1161_v42 = vmul.f32 -1.442695, %v1620_v14  ;;  %v1163_v19 = vmul.f32 -1.442695, %v1622_v15 }
 0x27a   :  { %1653 = vpow2.f32 %v1160_v16 }
 0x27b   :  { %1655 = vpow2.f32 %v1162_v18 }
 0x27c   :  { %1657 = vpow2.f32 %v1161_v42 }
 0x27d   :  { %1659 = vpow2.f32 %v1163_v19 }
 0x284   :  { %v1654_v44 = vpop.eup %1653 }
 0x285   :  { %v1656_v17 = vpop.eup %1655  ;;  %v911_v41 = vadd.f32 1.0, %v1654_v44 }
 0x286   :  { %v1658_v53 = vpop.eup %1657  ;;  %v913_v20 = vadd.f32 1.0, %v1656_v17 }
 0x287   :  { %v1660_v21 = vpop.eup %1659  ;;  %1661 = vrcp.f32 %v911_v41  ;;  %v912_v22 = vadd.f32 1.0, %v1658_v53 }
 0x288   :  { %1663 = vrcp.f32 %v913_v20  ;;  %v914_v23 = vadd.f32 1.0, %v1660_v21 }
 0x289   :  { %1665 = vrcp.f32 %v912_v22 }
 0x28a   :  { %1667 = vrcp.f32 %v914_v23 }
 0x291   :  { %v1662_v24 = vpop.eup %1661 }
 0x292   :  { %v1664_v25 = vpop.eup %1663  ;;  %v923_v29 = vmul.f32 %v1662_v24, %v1619_v10 }
 0x293   :  { %v1666_v26 = vpop.eup %1665  ;;  %v925_v31 = vmul.f32 %v1664_v25, %v1621_v11 }
 0x294   :  { %v1668_v27 = vpop.eup %1667  ;;  %v924_v28 = vmul.f32 %v1666_v26, %v1620_v14 }
 0x295   :  { %v926_v30 = vmul.f32 %v1668_v27, %v1622_v15 }
 0x296   :  { %1062 = vmatprep.mubr.f32.mxu0 %v924_v28 }
 0x297   :  { %1132 = vmatprep.mubr.f32.mxu1 %v926_v30  ;;  %1063 = vmatmul.mubr.f32.vlgmr.msra.gmra.mrb[4].mxu0 %v923_v29 }
 0x298   :  { %1133 = vmatmul.mubr.f32.vlgmr.msra.gmra.mrb[4].mxu1 %v925_v31 }
 0x36a   :  { %v1197_v32 = vpop.f32.mrb[4].mxu0 }
 0x36b   :  { %v1232_v33 = vpop.f32.mrb[4].mxu1  ;;  %v1198_v35 = vpop.f32.mrb[5].mxu0 }
 0x36c   :  { %v1199_v36 = vadd.f32 %v1198_v35, %v1197_v32  ;;  %v1233_v37 = vpop.f32.mrb[5].mxu1 }
 0x36d   :  { %v1234_v38 = vadd.f32 %v1233_v37, %v1232_v33 }
 0x36e   :  { %v1065_v39 = vadd.f32 %v1199_v36, %v1164_v34 }
 0x370   :  { %v1135_v47 = vadd.f32 %v1234_v38, %v1065_v39 }
 0x372   :  { %1138 = vst [vmem:[#allocation10] sm:$0xff] %v1135_v47 }
 0x373   :  { %1768 = shalt.err (!%p1765_p8)
}
 0x374   :  { %s1769_s6 = scalar_lea.hbm %s1962_s7, 128 }
 0x375   :  { %p1770_p9 = scmp.ne.s32.totalorder %s1962_s7, %s1769_s6  ;;  %p1773_p10 = scmp.lt.u32.totalorder %s1769_s6, %s1962_s7 }
 0x377   :  { %p1775_p11 = pnand %p1773_p10, %p1770_p9 }
 0x379   :  { %1778 = shalt.err (!%p1775_p11)
}
 0x37a   :  { %1148 = dma.vmem_to_hbm [thread:$0]  %s1146_s30, 128, %s1962_s7, [#allocation4]  }
 0x37b   :  { %1785 = dma.done.wait [#allocation4], 128  }
 0x37c   :  { %1786 = vsyncadd [#allocation4], 4294967168 }
 0x37d   :  { %1152 = vsyncpa [#allocation3], 1 }
 0x37e   :  { %1153 = vsyncpa [#allocation6], 1 }
 0x37f   :  { %1154 = vsyncpa [#allocation9], 1 }
 0x380   :  { %1155 = vsyncpa [#allocation4], 1 }

</bundles_post_ra>
